<compile_context>
chip_gen: v7x
topology: tpu7x:2x2x1
jax: 0.10.0
libtpu: 0.0.40
codegen_flags: <defaults>
</compile_context>

<pallas_src>
import functools

import jax
import jax.numpy as jnp
from jax.experimental import pallas as pl
from jax.experimental.pallas import tpu as pltpu


def _round_up(x, m):
    return ((x + m - 1) // m) * m


# ---------------------------------------------------------------------------
# Fused kernel: phase 0 = logits -> VMEM + online softmax-over-batch stats,
#               phase 1 = normalize from VMEM and write probabilities.
# ---------------------------------------------------------------------------
def fused_net_kernel(x_ref, w1_ref, b1_ref, w2_ref, o_ref,
                     logits_sc, m_sc, l_sc, *, real_b, tile_m):
    phase = pl.program_id(0)
    i = pl.program_id(1)

    @pl.when(jnp.logical_and(phase == 0, i == 0))
    def _init():
        m_sc[...] = jnp.full_like(m_sc, -jnp.inf)
        l_sc[...] = jnp.zeros_like(l_sc)

    row0 = pl.multiple_of(i * tile_m, tile_m)

    @pl.when(phase == 0)
    def _accumulate():
        # fc1 + ReLU: bf16 MXU operands, f32 accumulation, f32 bias add.
        x_bf = x_ref[...].astype(jnp.bfloat16)
        h = jnp.dot(x_bf, w1_ref[...], preferred_element_type=jnp.float32)
        h = jnp.maximum(h + b1_ref[...], 0.0).astype(jnp.bfloat16)

        # fc2 (no bias): f32 logits, kept in VMEM scratch (never round-trips HBM).
        logits = jnp.dot(h, w2_ref[...], preferred_element_type=jnp.float32)
        logits_sc[pl.ds(row0, tile_m), :] = logits

        # Online softmax statistics over the batch axis; rows past the real batch
        # (partial last tile -> undefined/garbage data) are masked out.
        row = i * tile_m + jax.lax.broadcasted_iota(jnp.int32, (tile_m, 1), 0)
        valid = row < real_b
        tile_max = jnp.max(jnp.where(valid, logits, -jnp.inf), axis=0, keepdims=True)
        m_new = jnp.maximum(m_sc[...], tile_max)
        alpha = jnp.exp(m_sc[...] - m_new)           # rescale old partial sum
        e = jnp.where(valid, jnp.exp(logits - m_new), 0.0)
        l_sc[...] = alpha * l_sc[...] + jnp.sum(e, axis=0, keepdims=True)
        m_sc[...] = m_new

    @pl.when(phase == 1)
    def _normalize():
        logits = logits_sc[pl.ds(row0, tile_m), :]
        e = jnp.exp(logits - m_sc[...])
        inv_l = pl.reciprocal(l_sc[...], approx=True)   # EUP, off the VPU divide path
        o_ref[...] = (e * inv_l).astype(o_ref.dtype)


def net_forward(x, w1, b1, w2, *, tile_m=512):
    """x: (B, 784) f32, w1: (784, 128), b1: (1, 128), w2: (128, 10)."""
    B, d_in = x.shape
    d_h = w1.shape[1]
    d_out = w2.shape[1]
    assert w1.shape[0] == d_in and w2.shape[0] == d_h and d_h % 128 == 0

    n_pad = _round_up(max(d_out, 128), 128)    # 10 -> 128: lane-dense stores / MXU N tile
    tile_m = min(tile_m, _round_up(B, 8))      # don't over-pad tiny batches
    tile_m = max(8, _round_up(tile_m, 8))      # sublane-aligned tile height
    nt = pl.cdiv(B, tile_m)

    # Small one-time casts of the resident operands (bias stays f32 for the VPU add).
    w1b = w1.astype(jnp.bfloat16)
    b1f = b1.reshape(1, d_h).astype(jnp.float32)
    w2b = jnp.pad(w2, ((0, 0), (0, n_pad - d_out))).astype(jnp.bfloat16)

    probs = pl.pallas_call(
        functools.partial(fused_net_kernel, real_b=B, tile_m=tile_m),
        out_shape=jax.ShapeDtypeStruct((B, n_pad), jnp.float32),
        grid=(2, nt),                                   # (phase, batch tile); tile axis fastest
        in_specs=[
            # x streams during phase 0 only; phase 1 parks on tile 0 so x is not re-read.
            pl.BlockSpec((tile_m, d_in), lambda p, i: (i * (1 - p), 0)),
            pl.BlockSpec((d_in, d_h), lambda p, i: (0, 0)),     # w1 resident
            pl.BlockSpec((1, d_h), lambda p, i: (0, 0)),        # b1 resident
            pl.BlockSpec((d_h, n_pad), lambda p, i: (0, 0)),    # w2 resident
        ],
        # Phase 0 parks on output block 0 and never writes it; the first real write happens
        # at phase-1 step 0 (same block index), so no uninitialized data is ever flushed.
        out_specs=pl.BlockSpec((tile_m, n_pad), lambda p, i: (i * p, 0)),
        scratch_shapes=[
            pltpu.VMEM((nt * tile_m, n_pad), jnp.float32),  # logits, persists across steps
            pltpu.VMEM((1, n_pad), jnp.float32),            # running column-wise max
            pltpu.VMEM((1, n_pad), jnp.float32),            # running column-wise sum of exp
        ],
        compiler_params=pltpu.CompilerParams(
            dimension_semantics=("arbitrary", "arbitrary")),    # phase + cross-tile reduction
    )(x, w1b, b1f, w2b)

    # Drop padded output columns; batch rows are already exact (B, ...).
    return probs[:, :d_out]


def init_params(key):
    # Mimic PyTorch's default Linear init: U(-1/sqrt(fan_in), 1/sqrt(fan_in)).
    # Weights stored pre-transposed as (in_features, out_features).
    k1, k2, k3 = jax.random.split(key, 3)
    d_in, d_h, d_out = 28 * 28, 128, 10
    bound1 = 1.0 / jnp.sqrt(d_in)
    bound2 = 1.0 / jnp.sqrt(d_h)
    w1 = jax.random.uniform(k1, (d_in, d_h), jnp.float32, -bound1, bound1)
    b1 = jax.random.uniform(k2, (1, d_h), jnp.float32, -bound1, bound1)
    w2 = jax.random.uniform(k3, (d_h, d_out), jnp.float32, -bound2, bound2)
    return w1, b1, w2


def reference_forward(x, w1, b1, w2):
    h = jnp.maximum(x @ w1 + b1, 0.0)
    logits = h @ w2
    return jax.nn.softmax(logits, axis=0)   # dim=0 (batch axis), as in the PyTorch module


if __name__ == "__main__":
    key = jax.random.PRNGKey(0)
    kx, kp = jax.random.split(key)

    # B=250: not a multiple of any tile size used, so the partial-last-tile masking of the
    # softmax-over-batch reduction and the OOB-write dropping are both exercised.
    B = 250
    x = jax.random.normal(kx, (B, 28 * 28), jnp.float32)
    w1, b1, w2 = init_params(kp)

    # Default (large) tile: single batch tile here.
    out = net_forward(x, w1, b1, w2)
    out = jax.block_until_ready(out)
    # Small tile: two batch tiles -> exercises the cross-tile online-softmax accumulation.
    out_multi_tile = net_forward(x, w1, b1, w2, tile_m=128)
    out_multi_tile = jax.block_until_ready(out_multi_tile)

    ref = reference_forward(x, w1, b1, w2)
    assert out.shape == (B, 10)
    # Tolerance relaxed vs the f32 reference because the kernel feeds the MXU in bfloat16
    # and uses the approximate EUP reciprocal for the softmax denominator.
    assert jnp.allclose(out, ref, atol=2e-3, rtol=5e-2), "mismatch vs JAX reference"
    assert jnp.allclose(out_multi_tile, ref, atol=2e-3, rtol=5e-2), "multi-tile mismatch"

    print("KERNEL_OK")
</pallas_src>

<mosaic_0001>
module attributes {stable_mosaic.version = 11 : i64} {
  func.func @fused_net_kernel(%arg0: i32, %arg1: i32, %arg2: memref<256x784xf32, #tpu.memory_space<vmem>>, %arg3: memref<784x128xbf16, #tpu.memory_space<vmem>>, %arg4: memref<1x128xf32, #tpu.memory_space<vmem>>, %arg5: memref<128x128xbf16, #tpu.memory_space<vmem>>, %arg6: memref<256x128xf32, #tpu.memory_space<vmem>>, %arg7: memref<256x128xf32, #tpu.memory_space<vmem>>, %arg8: memref<1x128xf32, #tpu.memory_space<vmem>>, %arg9: memref<1x128xf32, #tpu.memory_space<vmem>>) attributes {dimension_semantics = [#tpu.dimension_semantics<arbitrary>, #tpu.dimension_semantics<arbitrary>], iteration_bounds = array<i64: 2, 1>, scalar_prefetch = 0 : i64, scratch_operands = 3 : i64, tpu.core_type = #tpu.core_type<tc>, window_params = [{transform_indices = @transform_0, window_bounds = array<i64: 256, 784>}, {pipeline_mode = #tpu.pipeline_mode<synchronous>, transform_indices = @transform_1, window_bounds = array<i64: 784, 128>}, {pipeline_mode = #tpu.pipeline_mode<synchronous>, transform_indices = @transform_2, window_bounds = array<i64: 1, 128>}, {pipeline_mode = #tpu.pipeline_mode<synchronous>, transform_indices = @transform_3, window_bounds = array<i64: 128, 128>}, {transform_indices = @transform_4, window_bounds = array<i64: 256, 128>}]} {
    %c0_i32 = arith.constant 0 : i32
    %0 = arith.cmpi eq, %arg0, %c0_i32 : i32
    %c0_i32_0 = arith.constant 0 : i32
    %1 = arith.cmpi eq, %arg1, %c0_i32_0 : i32
    %2 = arith.andi %0, %1 : i1
    %3 = arith.extui %2 : i1 to i32
    %c0_i32_1 = arith.constant 0 : i32
    %4 = arith.cmpi ne, %3, %c0_i32_1 : i32
    scf.if %4 {
      %cst = arith.constant 0xFF800000 : f32
      %13 = vector.broadcast %cst : f32 to vector<1x128xf32>
      %c0 = arith.constant 0 : index
      %c0_5 = arith.constant 0 : index
      %14 = vector.load %arg8[%c0, %c0_5] : memref<1x128xf32, #tpu.memory_space<vmem>>, vector<1x128xf32>
      tpu.vector_store %arg8[%c0, %c0_5], %13 {strides = array<i32>} : memref<1x128xf32, #tpu.memory_space<vmem>>, vector<1x128xf32>,
      %cst_6 = arith.constant 0.000000e+00 : f32
      %15 = vector.broadcast %cst_6 : f32 to vector<1x128xf32>
      %c0_7 = arith.constant 0 : index
      %c0_8 = arith.constant 0 : index
      %16 = vector.load %arg9[%c0_7, %c0_8] : memref<1x128xf32, #tpu.memory_space<vmem>>, vector<1x128xf32>
      tpu.vector_store %arg9[%c0_7, %c0_8], %15 {strides = array<i32>} : memref<1x128xf32, #tpu.memory_space<vmem>>, vector<1x128xf32>,
    } else {
    }
    %c256_i32 = arith.constant 256 : i32
    %5 = arith.muli %arg1, %c256_i32 : i32
    %6 = tpu.assume_multiple %5, 256 : i32
    %c0_i32_2 = arith.constant 0 : i32
    %7 = arith.cmpi eq, %arg0, %c0_i32_2 : i32
    %8 = arith.extui %7 : i1 to i32
    %c0_i32_3 = arith.constant 0 : i32
    %9 = arith.cmpi ne, %8, %c0_i32_3 : i32
    scf.if %9 {
      %c0 = arith.constant 0 : index
      %c0_5 = arith.constant 0 : index
      %13 = vector.load %arg2[%c0, %c0_5] : memref<256x784xf32, #tpu.memory_space<vmem>>, vector<256x784xf32>
      %14 = arith.truncf %13 : vector<256x784xf32> to vector<256x784xbf16>
      %c0_6 = arith.constant 0 : index
      %c0_7 = arith.constant 0 : index
      %15 = vector.load %arg3[%c0_6, %c0_7] : memref<784x128xbf16, #tpu.memory_space<vmem>>, vector<784x128xbf16>
      %cst = arith.constant dense<0.000000e+00> : vector<256x128xf32>
      %16 = tpu.matmul %14, %15, %cst {dimension_numbers = #tpu.dot_dimension_numbers<[1], [0], [0], [1], [0, 0, 1, 1], [], []>} : vector<256x784xbf16>, vector<784x128xbf16>, vector<256x128xf32> -> vector<256x128xf32>
      %c0_8 = arith.constant 0 : index
      %c0_9 = arith.constant 0 : index
      %17 = vector.load %arg4[%c0_8, %c0_9] : memref<1x128xf32, #tpu.memory_space<vmem>>, vector<1x128xf32>
      %18 = vector.broadcast %17 : vector<1x128xf32> to vector<256x128xf32>
      %19 = arith.addf %16, %18 : vector<256x128xf32>
      %cst_10 = arith.constant 0.000000e+00 : f32
      %20 = vector.broadcast %cst_10 : f32 to vector<256x128xf32>
      %21 = arith.maximumf %19, %20 : vector<256x128xf32>
      %22 = arith.truncf %21 : vector<256x128xf32> to vector<256x128xbf16>
      %c0_11 = arith.constant 0 : index
      %c0_12 = arith.constant 0 : index
      %23 = vector.load %arg5[%c0_11, %c0_12] : memref<128x128xbf16, #tpu.memory_space<vmem>>, vector<128x128xbf16>
      %cst_13 = arith.constant dense<0.000000e+00> : vector<256x128xf32>
      %24 = tpu.matmul %22, %23, %cst_13 {dimension_numbers = #tpu.dot_dimension_numbers<[1], [0], [0], [1], [0, 0, 1, 1], [], []>} : vector<256x128xbf16>, vector<128x128xbf16>, vector<256x128xf32> -> vector<256x128xf32>
      %25 = arith.index_cast %6 : i32 to index
      %c0_14 = arith.constant 0 : index
      %26 = vector.load %arg7[%25, %c0_14] : memref<256x128xf32, #tpu.memory_space<vmem>>, vector<256x128xf32>
      tpu.vector_store %arg7[%25, %c0_14], %24 {strides = array<i32>} : memref<256x128xf32, #tpu.memory_space<vmem>>, vector<256x128xf32>,
      %c256_i32_15 = arith.constant 256 : i32
      %27 = arith.muli %arg1, %c256_i32_15 : i32
      %28 = tpu.iota {dimensions = array<i32: 0>} : vector<256x1xi32>
      %29 = vector.broadcast %27 : i32 to vector<256x1xi32>
      %30 = arith.addi %29, %28 : vector<256x1xi32>
      %c250_i32 = arith.constant 250 : i32
      %31 = vector.broadcast %c250_i32 : i32 to vector<256x1xi32>
      %32 = arith.cmpi slt, %30, %31 : vector<256x1xi32>
      %cst_16 = arith.constant 0xFF800000 : f32
      %33 = vector.shape_cast %32 : vector<256x1xi1> to vector<256x1xi1>
      %34 = vector.broadcast %33 : vector<256x1xi1> to vector<256x128xi1>
      %35 = vector.broadcast %cst_16 : f32 to vector<256x128xf32>
      %36 = arith.select %34, %24, %35 : vector<256x128xi1>, vector<256x128xf32>
      %cst_17 = arith.constant dense<0xFF800000> : vector<128xf32>
      %37 = vector.multi_reduction <maximumf>, %36, %cst_17 [0] : vector<256x128xf32> to vector<128xf32>
      %38 = vector.shape_cast %37 : vector<128xf32> to vector<1x128xf32>
      %c0_18 = arith.constant 0 : index
      %c0_19 = arith.constant 0 : index
      %39 = vector.load %arg8[%c0_18, %c0_19] : memref<1x128xf32, #tpu.memory_space<vmem>>, vector<1x128xf32>
      %40 = arith.maximumf %39, %38 : vector<1x128xf32>
      %c0_20 = arith.constant 0 : index
      %c0_21 = arith.constant 0 : index
      %41 = vector.load %arg8[%c0_20, %c0_21] : memref<1x128xf32, #tpu.memory_space<vmem>>, vector<1x128xf32>
      %42 = arith.subf %41, %40 : vector<1x128xf32>
      %43 = math.exp %42 : vector<1x128xf32>
      %44 = vector.broadcast %40 : vector<1x128xf32> to vector<256x128xf32>
      %45 = arith.subf %24, %44 : vector<256x128xf32>
      %46 = math.exp %45 : vector<256x128xf32>
      %cst_22 = arith.constant 0.000000e+00 : f32
      %47 = vector.shape_cast %32 : vector<256x1xi1> to vector<256x1xi1>
      %48 = vector.broadcast %47 : vector<256x1xi1> to vector<256x128xi1>
      %49 = vector.broadcast %cst_22 : f32 to vector<256x128xf32>
      %50 = arith.select %48, %46, %49 : vector<256x128xi1>, vector<256x128xf32>
      %c0_23 = arith.constant 0 : index
      %c0_24 = arith.constant 0 : index
      %51 = vector.load %arg9[%c0_23, %c0_24] : memref<1x128xf32, #tpu.memory_space<vmem>>, vector<1x128xf32>
      %52 = arith.mulf %43, %51 : vector<1x128xf32>
      %cst_25 = arith.constant dense<0.000000e+00> : vector<128xf32>
      %53 = vector.multi_reduction <add>, %50, %cst_25 [0] : vector<256x128xf32> to vector<128xf32>
      %54 = vector.shape_cast %53 : vector<128xf32> to vector<1x128xf32>
      %55 = arith.addf %52, %54 : vector<1x128xf32>
      %c0_26 = arith.constant 0 : index
      %c0_27 = arith.constant 0 : index
      %56 = vector.load %arg9[%c0_26, %c0_27] : memref<1x128xf32, #tpu.memory_space<vmem>>, vector<1x128xf32>
      tpu.vector_store %arg9[%c0_26, %c0_27], %55 {strides = array<i32>} : memref<1x128xf32, #tpu.memory_space<vmem>>, vector<1x128xf32>,
      %c0_28 = arith.constant 0 : index
      %c0_29 = arith.constant 0 : index
      %57 = vector.load %arg8[%c0_28, %c0_29] : memref<1x128xf32, #tpu.memory_space<vmem>>, vector<1x128xf32>
      tpu.vector_store %arg8[%c0_28, %c0_29], %40 {strides = array<i32>} : memref<1x128xf32, #tpu.memory_space<vmem>>, vector<1x128xf32>,
    } else {
    }
    %c1_i32 = arith.constant 1 : i32
    %10 = arith.cmpi eq, %arg0, %c1_i32 : i32
    %11 = arith.extui %10 : i1 to i32
    %c0_i32_4 = arith.constant 0 : i32
    %12 = arith.cmpi ne, %11, %c0_i32_4 : i32
    scf.if %12 {
      %13 = arith.index_cast %6 : i32 to index
      %c0 = arith.constant 0 : index
      %14 = vector.load %arg7[%13, %c0] : memref<256x128xf32, #tpu.memory_space<vmem>>, vector<256x128xf32>
      %c0_5 = arith.constant 0 : index
      %c0_6 = arith.constant 0 : index
      %15 = vector.load %arg8[%c0_5, %c0_6] : memref<1x128xf32, #tpu.memory_space<vmem>>, vector<1x128xf32>
      %16 = vector.broadcast %15 : vector<1x128xf32> to vector<256x128xf32>
      %17 = arith.subf %14, %16 : vector<256x128xf32>
      %18 = math.exp %17 : vector<256x128xf32>
      %c0_7 = arith.constant 0 : index
      %c0_8 = arith.constant 0 : index
      %19 = vector.load %arg9[%c0_7, %c0_8] : memref<1x128xf32, #tpu.memory_space<vmem>>, vector<1x128xf32>
      %20 = tpu.reciprocal %19 {approx = true} : vector<1x128xf32> -> vector<1x128xf32>
      %21 = vector.broadcast %20 : vector<1x128xf32> to vector<256x128xf32>
      %22 = arith.mulf %18, %21 : vector<256x128xf32>
      %c0_9 = arith.constant 0 : index
      %c0_10 = arith.constant 0 : index
      %23 = vector.load %arg6[%c0_9, %c0_10] : memref<256x128xf32, #tpu.memory_space<vmem>>, vector<256x128xf32>
      tpu.vector_store %arg6[%c0_9, %c0_10], %22 {strides = array<i32>} : memref<256x128xf32, #tpu.memory_space<vmem>>, vector<256x128xf32>,
    } else {
    }
    return
  }
  func.func @transform_0(%arg0: i32, %arg1: i32) -> (i32, i32) {
    %c1_i32 = arith.constant 1 : i32
    %0 = arith.subi %c1_i32, %arg0 : i32
    %1 = arith.muli %arg1, %0 : i32
    %c0_i32 = arith.constant 0 : i32
    %c0_i32_0 = arith.constant 0 : i32
    return %1, %c0_i32 : i32, i32
  }
  func.func @transform_1(%arg0: i32, %arg1: i32) -> (i32, i32) {
    %c0_i32 = arith.constant 0 : i32
    %c0_i32_0 = arith.constant 0 : i32
    %c0_i32_1 = arith.constant 0 : i32
    return %c0_i32, %c0_i32_0 : i32, i32
  }
  func.func @transform_2(%arg0: i32, %arg1: i32) -> (i32, i32) {
    %c0_i32 = arith.constant 0 : i32
    %c0_i32_0 = arith.constant 0 : i32
    %c0_i32_1 = arith.constant 0 : i32
    return %c0_i32, %c0_i32_0 : i32, i32
  }
  func.func @transform_3(%arg0: i32, %arg1: i32) -> (i32, i32) {
    %c0_i32 = arith.constant 0 : i32
    %c0_i32_0 = arith.constant 0 : i32
    %c0_i32_1 = arith.constant 0 : i32
    return %c0_i32, %c0_i32_0 : i32, i32
  }
  func.func @transform_4(%arg0: i32, %arg1: i32) -> (i32, i32) {
    %0 = arith.muli %arg1, %arg0 : i32
    %c0_i32 = arith.constant 0 : i32
    %c0_i32_0 = arith.constant 0 : i32
    return %0, %c0_i32 : i32, i32
  }
}

</mosaic_0001>

<bundles_post_ra>
// kernel: tpu_custom_call.1
= control target key start
LH: loop header
LB: loop body
LE: loop exit
PB: predicated region body
PF: predicated region fallthrough
CT: control target
= control target key end

     0   :  { %9 = vsyncpa [#allocation6], 0  ;;  %s4988_s0 = inlined_call_operand.vmem [shape: f32[250,784], index: 0, kind: input, shape index: {}]   ;;  %s4989_s1 = inlined_call_operand.vmem [shape: bf16[784,128], index: 1, kind: input, shape index: {}]   ;;  %s4990_s2 = inlined_call_operand.vmem [shape: f32[1,128], index: 2, kind: input, shape index: {}]   ;;  %s4991_s3 = inlined_call_operand.vmem [shape: bf16[128,128], index: 3, kind: input, shape index: {}]   ;;  %s4992_s4 = inlined_call_operand.hbm [shape: f32[250,128], index: 4, kind: output, shape index: {}]  }
   0x1   :  { %11 = vsyncpa [#allocation6 + $0x1], 0  ;;  %s3552_s15 = smov 0   ;;  %s3554_s16 = smov 0  }
   0x2   :  { %s3556_s17 = smov 0  }
   0x3 LB: > { %s2691_s18 = sadd.s32 4294967295, %s3520_s17   ;;  %s2692_s19 = sadd.s32 4294967294, %s3520_s17   ;;  %s3520_s17 = sphi %s3556_s17, %s17_s17   ;;  %s3516_s16 = sphi %s3554_s16, %s4997_s16   ;;  %s3512_s15 = sphi %s3552_s15, %s4996_s15  }
   0x4   : > { %s29_s20 = sadd.s32 1, %s3516_s16  ;;  %p2696_p0 = scmp.ge.s32.totalorder %s3520_s17, 1 }
   0x5   : > { %p31_p1 = scmp.ge.s32.totalorder %s29_s20, 2  ;;  %p189_p2 = scmp.lt.s32.totalorder %s3520_s17, 3 }
   0x7   : > { %s4999_s20 = smov (%p31_p1, %s29_s20), 0  ;;  %p190_p3 = pnand %p2696_p0, %p189_p2 }
   0x8   : > { %p232_p4 = scmp.eq.s32.totalorder (!%p190_p3), %s3512_s15, 0 }
   0x9   : > { %193 = sbr.rel (%p190_p3) target bundleno = 942 (0x3ae), region = 36 }
  0x10   : > { %237 = sbr.rel (!%p232_p4) target bundleno = 23 (0x17), region = 40  ;;  %v3522_v0 = vmov (%p232_p4), -inf   ;;  %v3523_v1 = vmov (%p232_p4), 0.0  }
  0x11   : > { %238 = vst [vmem:[#allocation3] sm:$0x1] (%p232_p4), %v3522_v0  ;;  %239 = vst [vmem:[#allocation4] sm:$0x1] (%p232_p4), %v3523_v1 }
  0x17 PF: > { %p2698_p5 = scmp.ne.s32.totalorder %s3512_s15, 0 }
  0x18   : > { %v3279_v2 = vld [vmem:[%s4989_s1 + $0x40] sm:$0xff] (!%p2698_p5)   ;;  %v3283_v6 = vld [vmem:[%s4989_s1 + $0x48] sm:$0xff] (!%p2698_p5)   ;;  %v3287_v10 = vld [vmem:[%s4989_s1 + $0x50] sm:$0xff] (!%p2698_p5)   ;;  %vm979_vm0 = vcmask (!%p2698_p5), 130048  }
  0x19   : > { %243 = sbr.rel (%p2698_p5) target bundleno = 865 (0x361), region = 44  ;;  %v3280_v3 = vld [vmem:[%s4989_s1] sm:$0xff] (!%p2698_p5)   ;;  %2780 = vmatprep.subr.bf16.mxu0 (!%p2698_p5), %v3279_v2  ;;  %v3284_v7 = vld [vmem:[%s4989_s1 + $0x8] sm:$0xff] (!%p2698_p5)   ;;  %v3288_v11 = vld [vmem:[%s4989_s1 + $0x10] sm:$0xff] (!%p2698_p5)  }
  0x1a   : > { %v3281_v4 = vld [vmem:[%s4989_s1 + $0xc0] sm:$0xff] (!%p2698_p5)   ;;  %2781 = vmatpush3.bf16.msra.mxu0 (!%p2698_p5), %v3280_v3  ;;  %v3285_v8 = vld [vmem:[%s4989_s1 + $0xc8] sm:$0xff] (!%p2698_p5)   ;;  %v3289_v12 = vld [vmem:[%s4989_s1 + $0xd0] sm:$0xff] (!%p2698_p5)  }
  0x1b   : > { %v3282_v5 = vld [vmem:[%s4989_s1 + $0x80] sm:$0xff] (!%p2698_p5)   ;;  %2892 = vmatprep.subr.bf16.mxu1 (!%p2698_p5), %v3281_v4  ;;  %2782 = vmatprep.subr.bf16.mxu0 (!%p2698_p5), %v3283_v6  ;;  %v3286_v9 = vld [vmem:[%s4989_s1 + $0x88] sm:$0xff] (!%p2698_p5)   ;;  %v3290_v13 = vld [vmem:[%s4989_s1 + $0x90] sm:$0xff] (!%p2698_p5)  }
  0x1c   : > { %2893 = vmatpush3.bf16.msra.mxu1 (!%p2698_p5), %v3282_v5  ;;  %v3291_v14 = vld [vmem:[%s4989_s1 + $0x58] sm:$0xff] (!%p2698_p5)   ;;  %v3295_v18 = vld [vmem:[%s4989_s1 + $0x60] sm:$0xff] (!%p2698_p5)   ;;  %v3299_v22 = vld [vmem:[%s4989_s1 + $0x68] sm:$0xff] (!%p2698_p5)  }
  0x1d   : > { %2894 = vmatprep.subr.bf16.mxu1 (!%p2698_p5), %v3285_v8  ;;  %v3292_v15 = vld [vmem:[%s4989_s1 + $0x18] sm:$0xff] (!%p2698_p5)   ;;  %v3296_v19 = vld [vmem:[%s4989_s1 + $0x20] sm:$0xff] (!%p2698_p5)   ;;  %v3300_v23 = vld [vmem:[%s4989_s1 + $0x28] sm:$0xff] (!%p2698_p5)  }
  0x1e   : > { %2783 = vmatpush3.bf16.msra.mxu0 (!%p2698_p5), %v3284_v7  ;;  %v3293_v16 = vld [vmem:[%s4989_s1 + $0xd8] sm:$0xff] (!%p2698_p5)   ;;  %v3297_v20 = vld [vmem:[%s4989_s1 + $0xe0] sm:$0xff] (!%p2698_p5)   ;;  %v3301_v24 = vld [vmem:[%s4989_s1 + $0xe8] sm:$0xff] (!%p2698_p5)  }
  0x1f   : > { %2784 = vmatprep.subr.bf16.mxu0 (!%p2698_p5), %v3287_v10  ;;  %v3294_v17 = vld [vmem:[%s4989_s1 + $0x98] sm:$0xff] (!%p2698_p5)   ;;  %v3298_v21 = vld [vmem:[%s4989_s1 + $0xa0] sm:$0xff] (!%p2698_p5)   ;;  %v3302_v25 = vld [vmem:[%s4989_s1 + $0xa8] sm:$0xff] (!%p2698_p5)  }
  0x20   : > { %2895 = vmatpush3.bf16.msra.mxu1 %v3286_v9  ;;  %v3303_v26 = vld [vmem:[%s4989_s1 + $0x70] sm:$0xff]   ;;  %v3307_v30 = vld [vmem:[%s4989_s1 + $0x78] sm:$0xff]   ;;  %v245_v33 = vld [vmem:[%s4988_s0 + $0x8] sm:$0xff] }
  0x21   : > { %2896 = vmatprep.subr.bf16.mxu1 %v3289_v12  ;;  %v3304_v27 = vld [vmem:[%s4989_s1 + $0x30] sm:$0xff]   ;;  %v3308_v31 = vld [vmem:[%s4989_s1 + $0x38] sm:$0xff]   ;;  %v252_v34 = vld [vmem:[%s4988_s0 + $0x40] sm:$0xff] }
  0x22   : > { %2785 = vmatpush3.bf16.msra.mxu0 %v3288_v11  ;;  %v3305_v28 = vld [vmem:[%s4989_s1 + $0xf0] sm:$0xff]   ;;  %v3309_v32 = vld [vmem:[%s4989_s1 + $0xf8] sm:$0xff]   ;;  %v469_v35 = vpack.c.bf16 %v252_v34, %v245_v33  ;;  %v244_v37 = vld [vmem:[%s4988_s0] sm:$0xff] }
  0x23   : > { %2786 = vmatprep.subr.bf16.mxu0 %v3291_v14  ;;  %v3306_v29 = vld [vmem:[%s4989_s1 + $0xb0] sm:$0xff]   ;;  %v3310_v36 = vld [vmem:[%s4989_s1 + $0xb8] sm:$0xff]   ;;  %v3311_v40 = vld [vmem:[%s4989_s1 + $0x140] sm:$0xff]  }
  0x24   : > { %2897 = vmatpush3.bf16.msra.mxu1 %v3290_v13  ;;  %v251_v38 = vld [vmem:[%s4988_s0 + $0x38] sm:$0xff]  ;;  %1060 = vmatprep.mubr.bf16.mxu0 %v469_v35  ;;  %v254_v42 = vld [vmem:[%s4988_s0 + $0x50] sm:$0xff]  ;;  %v3312_v44 = vld [vmem:[%s4989_s1 + $0x100] sm:$0xff]  }
  0x25   : > { %2898 = vmatprep.subr.bf16.mxu1 %v3293_v16  ;;  %v468_v39 = vpack.c.bf16 %v251_v38, %v244_v37  ;;  %v247_v41 = vld [vmem:[%s4988_s0 + $0x18] sm:$0xff]  ;;  %v246_v45 = vld [vmem:[%s4988_s0 + $0x10] sm:$0xff]  ;;  %v253_v46 = vld [vmem:[%s4988_s0 + $0x48] sm:$0xff] }
  0x26   : > { %2787 = vmatpush3.bf16.msra.mxu0 %v3292_v15  ;;  %v471_v43 = vpack.c.bf16 %v254_v42, %v247_v41  ;;  %v259_v47 = vld [vmem:[%s4988_s0 + $0x78] sm:$0xff]  ;;  %v470_v48 = vpack.c.bf16 %v253_v46, %v246_v45  ;;  %v266_v49 = vld [vmem:[%s4988_s0 + $0xb0] sm:$0xff]  ;;  %v265_v51 = vld [vmem:[%s4988_s0 + $0xa8] sm:$0xff] }
  0x27   : > { %2788 = vmatprep.subr.bf16.mxu0 %v3295_v18  ;;  %v258_v50 = vld [vmem:[%s4988_s0 + $0x70] sm:$0xff]  ;;  %v476_v52 = vpack.c.bf16 %v266_v49, %v259_v47  ;;  %v261_v53 = vld [vmem:[%s4988_s0 + $0x88] sm:$0xff]  ;;  %v268_v54 = vld [vmem:[%s4988_s0 + $0xc0] sm:$0xff] }
  0x28   : > { %2899 = vmatpush3.bf16.msra.mxu1 %v3294_v17  ;;  %1221 = vmatprep.mubr.bf16.mxu1 %v471_v43  ;;  %v478_v55 = vpack.c.bf16 %v268_v54, %v261_v53  ;;  %v273_v56 = vld [vmem:[%s4988_s0 + $0xe8] sm:$0xff]  ;;  %v280_v57 = vld [vmem:[%s4988_s0 + $0x120] sm:$0xff]  ;;  %v475_v58 = vpack.c.bf16 %v265_v51, %v258_v50  ;;  %v267_v60 = vld [vmem:[%s4988_s0 + $0xb8] sm:$0xff] }
  0x29   : > { %2900 = vmatprep.subr.bf16.mxu1 %v3297_v20  ;;  %v260_v59 = vld [vmem:[%s4988_s0 + $0x80] sm:$0xff]  ;;  %v483_v61 = vpack.c.bf16 %v280_v57, %v273_v56  ;;  %v3313_v62 = vld [vmem:[%s4989_s1 + $0x148] sm:$0xff]   ;;  %v275_v63 = vld [vmem:[%s4988_s0 + $0xf8] sm:$0xff] }
  0x2a   : > { %2789 = vmatpush3.bf16.msra.mxu0 %v3296_v19  ;;  %v282_v0 = vld [vmem:[%s4988_s0 + $0x130] sm:$0xff]  ;;  %v477_v1 = vpack.c.bf16 %v267_v60, %v260_v59  ;;  %v3314_v2 = vld [vmem:[%s4989_s1 + $0x108] sm:$0xff]   ;;  %v272_v4 = vld [vmem:[%s4988_s0 + $0xe0] sm:$0xff] }
  0x2b   : > { %2790 = vmatprep.subr.bf16.mxu0 %v3299_v22  ;;  %v485_v3 = vpack.c.bf16 %v282_v0, %v275_v63  ;;  %v279_v5 = vld [vmem:[%s4988_s0 + $0x118] sm:$0xff]  ;;  %v294_v7 = vld [vmem:[%s4988_s0 + $0x190] sm:$0xff]  ;;  %v281_v9 = vld [vmem:[%s4988_s0 + $0x128] sm:$0xff] }
  0x2c   : > { %2901 = vmatpush3.bf16.msra.mxu1 %v3298_v21  ;;  %v287_v6 = vld [vmem:[%s4988_s0 + $0x158] sm:$0xff]  ;;  %v274_v8 = vld [vmem:[%s4988_s0 + $0xf0] sm:$0xff]  ;;  %v482_v10 = vpack.c.bf16 %v279_v5, %v272_v4  ;;  %v289_v13 = vld [vmem:[%s4988_s0 + $0x168] sm:$0xff] }
  0x2d   : > { %2902 = vmatprep.subr.bf16.mxu1 %v3301_v24  ;;  %v3315_v11 = vld [vmem:[%s4989_s1 + $0x150] sm:$0xff]   ;;  %v490_v12 = vpack.c.bf16 %v294_v7, %v287_v6  ;;  %v296_v14 = vld [vmem:[%s4988_s0 + $0x1a0] sm:$0xff]  ;;  %v484_v16 = vpack.c.bf16 %v281_v9, %v274_v8  ;;  %v293_v19 = vld [vmem:[%s4988_s0 + $0x188] sm:$0xff] }
  0x2e   : > { %2791 = vmatpush3.bf16.msra.mxu0 %v3300_v23  ;;  %v3316_v15 = vld [vmem:[%s4989_s1 + $0x110] sm:$0xff]   ;;  %v492_v17 = vpack.c.bf16 %v296_v14, %v289_v13  ;;  %v288_v20 = vld [vmem:[%s4988_s0 + $0x160] sm:$0xff]  ;;  %v301_v21 = vld [vmem:[%s4988_s0 + $0x1c8] sm:$0xff] }
  0x2f   : > { %2792 = vmatprep.subr.bf16.mxu0 %v3303_v26  ;;  %v286_v18 = vld [vmem:[%s4988_s0 + $0x150] sm:$0xff]  ;;  %v308_v22 = vld [vmem:[%s4988_s0 + $0x200] sm:$0xff]  ;;  %v295_v23 = vld [vmem:[%s4988_s0 + $0x198] sm:$0xff] }
  0x30   : > { %2903 = vmatpush3.bf16.msra.mxu1 %v3302_v25  ;;  %v489_v24 = vpack.c.bf16 %v293_v19, %v286_v18  ;;  %v303_v25 = vld [vmem:[%s4988_s0 + $0x1d8] sm:$0xff]  ;;  %v310_v26 = vld [vmem:[%s4988_s0 + $0x210] sm:$0xff]  ;;  %v3319_v37 = vld [vmem:[%s4989_s1 + $0x160] sm:$0xff]  }
  0x31   : > { %2904 = vmatprep.subr.bf16.mxu1 %v3305_v28  ;;  %v497_v28 = vpack.c.bf16 %v308_v22, %v301_v21  ;;  %v307_v33 = vld [vmem:[%s4988_s0 + $0x1f8] sm:$0xff]  ;;  %v322_v35 = vld [vmem:[%s4988_s0 + $0x270] sm:$0xff]  ;;  %v317_v41 = vld [vmem:[%s4988_s0 + $0x248] sm:$0xff] }
  0x32   : > { %2793 = vmatpush3.bf16.msra.mxu0 %v3304_v27  ;;  %v3317_v27 = vld [vmem:[%s4989_s1 + $0x158] sm:$0xff]   ;;  %v324_v42 = vld [vmem:[%s4988_s0 + $0x280] sm:$0xff]  ;;  %v314_v47 = vld [vmem:[%s4988_s0 + $0x230] sm:$0xff] }
  0x33   : > { %2794 = vmatprep.subr.bf16.mxu0 %v3307_v30  ;;  %v491_v30 = vpack.c.bf16 %v295_v23, %v288_v20  ;;  %v315_v34 = vld [vmem:[%s4988_s0 + $0x238] sm:$0xff]  ;;  %v3320_v43 = vld [vmem:[%s4989_s1 + $0x120] sm:$0xff]   ;;  %v506_v46 = vpack.c.bf16 %v324_v42, %v317_v41  ;;  %v329_v50 = vld [vmem:[%s4988_s0 + $0x2a8] sm:$0xff] }
  0x34   : > { %2905 = vmatpush3.bf16.msra.mxu1 %v3306_v29  ;;  %v3318_v29 = vld [vmem:[%s4989_s1 + $0x118] sm:$0xff]   ;;  %v316_v49 = vld [vmem:[%s4988_s0 + $0x240] sm:$0xff]  ;;  %v338_v57 = vld [vmem:[%s4988_s0 + $0x2f0] sm:$0xff] }
  0x35   : > { %2906 = vmatprep.subr.bf16.mxu1 %v3309_v32  ;;  %v300_v32 = vld [vmem:[%s4988_s0 + $0x1c0] sm:$0xff]  ;;  %v323_v54 = vld [vmem:[%s4988_s0 + $0x278] sm:$0xff]  ;;  %v350_v0 = vld [vmem:[%s4988_s0 + $0x350] sm:$0xff] }
  0x36   : > { %2795 = vmatpush3.bf16.msra.mxu0 %v3308_v31  ;;  %v499_v31 = vpack.c.bf16 %v310_v26, %v303_v25  ;;  %v496_v38 = vpack.c.bf16 %v307_v33, %v300_v32  ;;  %v336_v51 = vld [vmem:[%s4988_s0 + $0x2e0] sm:$0xff]  ;;  %v505_v59 = vpack.c.bf16 %v323_v54, %v316_v49  ;;  %v343_v63 = vld [vmem:[%s4988_s0 + $0x318] sm:$0xff]  ;;  %v3325_v5 = vld [vmem:[%s4989_s1 + $0x130] sm:$0xff]  }
  0x37   : > { %3004 = vmatprep.subr.bf16.mxu0 %v3311_v40  ;;  %v504_v40 = vpack.c.bf16 %v322_v35, %v315_v34  ;;  %v511_v56 = vpack.c.bf16 %v336_v51, %v329_v50  ;;  %v518_v6 = vpack.c.bf16 %v350_v0, %v343_v63  ;;  %v345_v7 = vld [vmem:[%s4988_s0 + $0x328] sm:$0xff]  ;;  %v352_v8 = vld [vmem:[%s4988_s0 + $0x360] sm:$0xff]  ;;  %v351_v18 = vld [vmem:[%s4988_s0 + $0x358] sm:$0xff] }
  0x38   : > { %2907 = vmatpush3.bf16.msra.mxu1 %v3310_v36  ;;  %v302_v36 = vld [vmem:[%s4988_s0 + $0x1d0] sm:$0xff]  ;;  %v357_v13 = vld [vmem:[%s4988_s0 + $0x388] sm:$0xff]  ;;  %v364_v14 = vld [vmem:[%s4988_s0 + $0x3c0] sm:$0xff] }
  0x39   : > { %1061 = vmatmul.mubr.bf16.vlgmr.msra.gmra.mrb[0].mxu0 %v468_v39  ;;  %v309_v39 = vld [vmem:[%s4988_s0 + $0x208] sm:$0xff]  ;;  %v3327_v19 = vld [vmem:[%s4989_s1 + $0x138] sm:$0xff]   ;;  %v525_v20 = vpack.c.bf16 %v364_v14, %v357_v13  ;;  %v366_v22 = vld [vmem:[%s4988_s0 + $0x3d0] sm:$0xff] }
  0x3a   : > { %3005 = vmatpush3.bf16.msra.mxu0 %v3312_v44  ;;  %1068 = vmatprep.mubr.bf16.mxu0 %v476_v52  ;;  %v3321_v44 = vld [vmem:[%s4989_s1 + $0x180] sm:$0xff]   ;;  %v498_v45 = vpack.c.bf16 %v309_v39, %v302_v36  ;;  %v3322_v52 = vld [vmem:[%s4989_s1 + $0x168] sm:$0xff]   ;;  %v359_v21 = vld [vmem:[%s4988_s0 + $0x398] sm:$0xff] }
  0x3b   : > { %1222 = vmatmul.mubr.bf16.vlgmr.msra.gmra.mrb[0].mxu1 %v470_v48  ;;  %3006 = vmatprep.subr.bf16.mxu0 %v3313_v62  ;;  %v321_v48 = vld [vmem:[%s4988_s0 + $0x268] sm:$0xff]  ;;  %v335_v62 = vld [vmem:[%s4988_s0 + $0x2d8] sm:$0xff]  ;;  %v356_v25 = vld [vmem:[%s4988_s0 + $0x380] sm:$0xff] }
  0x3c   : > { %1229 = vmatprep.mubr.bf16.mxu1 %v478_v55  ;;  %3157 = vmatprep.subr.bf16.mxu1 %v3321_v44  ;;  %v503_v53 = vpack.c.bf16 %v321_v48, %v314_v47  ;;  %v331_v55 = vld [vmem:[%s4988_s0 + $0x2b8] sm:$0xff]  ;;  %v373_v33 = vld [vmem:[%s4988_s0 + $0x408] sm:$0xff]  ;;  %v380_v34 = vld [vmem:[%s4988_s0 + $0x440] sm:$0xff] }
  0x3d   : > { %3158 = vmatpush3.bf16.msra.mxu1 %v3321_v44  ;;  %v513_v60 = vpack.c.bf16 %v338_v57, %v331_v55  ;;  %v363_v26 = vld [vmem:[%s4988_s0 + $0x3b8] sm:$0xff]  ;;  %v534_v36 = vpack.c.bf16 %v380_v34, %v373_v33  ;;  %v385_v39 = vld [vmem:[%s4988_s0 + $0x468] sm:$0xff]  ;;  %v372_v42 = vld [vmem:[%s4988_s0 + $0x400] sm:$0xff] }
  0x3e   : > { %3007 = vmatpush3.bf16.msra.mxu0 %v3314_v2  ;;  %v337_v2 = vld [vmem:[%s4988_s0 + $0x2e8] sm:$0xff]  ;;  %v384_v49 = vld [vmem:[%s4988_s0 + $0x460] sm:$0xff]  ;;  %v391_v50 = vld [vmem:[%s4988_s0 + $0x498] sm:$0xff] }
  0x3f   : > { %3008 = vmatprep.subr.bf16.mxu0 %v3315_v11  ;;  %v520_v11 = vpack.c.bf16 %v352_v8, %v345_v7  ;;  %v399_v51 = vld [vmem:[%s4988_s0 + $0x4d8] sm:$0xff]  ;;  %v538_v54 = vpack.c.bf16 %v391_v50, %v384_v49  ;;  %v393_v55 = vld [vmem:[%s4988_s0 + $0x4a8] sm:$0xff]  ;;  %v408_v57 = vld [vmem:[%s4988_s0 + $0x520] sm:$0xff] }
  0x40   : > { %v413_v63 = vld [vmem:[%s4988_s0 + $0x548] sm:$0xff]  ;;  %v420_v0 = vld [vmem:[%s4988_s0 + $0x580] sm:$0xff]  ;;  %v414_v14 = vld [vmem:[%s4988_s0 + $0x550] sm:$0xff] }
  0x41   : > { %1069 = vmatmul.mubr.bf16.gmra.mrb[4].mxu0 %v475_v58  ;;  %v3323_v58 = vld [vmem:[%s4989_s1 + $0x128] sm:$0xff]   ;;  %v440_v33 = vld [vmem:[%s4988_s0 + $0x620] sm:$0xff]  ;;  %v447_v34 = vld [vmem:[%s4988_s0 + $0x658] sm:$0xff] }
  0x42   : > { %1076 = vmatprep.mubr.bf16.mxu0 %v483_v61  ;;  %3009 = vmatpush3.bf16.msra.mxu0 %v3316_v15  ;;  %v328_v61 = vld [vmem:[%s4988_s0 + $0x2a0] sm:$0xff]  ;;  %v3326_v15 = vld [vmem:[%s4989_s1 + $0x178] sm:$0xff]  }
  0x43   : > { %1230 = vmatmul.mubr.bf16.gmra.mrb[4].mxu1 %v477_v1  ;;  %3010 = vmatprep.subr.bf16.mxu0 %v3317_v27  ;;  %v330_v1 = vld [vmem:[%s4988_s0 + $0x2b0] sm:$0xff]  ;;  %v510_v4 = vpack.c.bf16 %v335_v62, %v328_v61  ;;  %v371_v27 = vld [vmem:[%s4988_s0 + $0x3f8] sm:$0xff]  ;;  %v405_v62 = vld [vmem:[%s4988_s0 + $0x508] sm:$0xff] }
  0x44   : > { %1237 = vmatprep.mubr.bf16.mxu1 %v485_v3  ;;  %v3324_v3 = vld [vmem:[%s4989_s1 + $0x170] sm:$0xff]   ;;  %v512_v9 = vpack.c.bf16 %v337_v2, %v330_v1  ;;  %v400_v2 = vld [vmem:[%s4988_s0 + $0x4e0] sm:$0xff] }
  0x45   : > { %v398_v61 = vld [vmem:[%s4988_s0 + $0x4d0] sm:$0xff]  ;;  %v456_v50 = vld [vmem:[%s4988_s0 + $0x6a0] sm:$0xff] }
  0x46   : > { %3011 = vmatpush3.bf16.msra.mxu0 %v3318_v29  ;;  %v524_v29 = vpack.c.bf16 %v363_v26, %v356_v25  ;;  %v545_v1 = vpack.c.bf16 %v405_v62, %v398_v61  ;;  %v428_v26 = vld [vmem:[%s4988_s0 + $0x5c0] sm:$0xff] }
  0x47   : > { %3012 = vmatprep.subr.bf16.mxu0 %v3319_v37  ;;  %v370_v37 = vld [vmem:[%s4988_s0 + $0x3f0] sm:$0xff]  ;;  %v264_v62 = vld [vmem:[%s4988_s0 + $0xa0] sm:$0xff] }
  0x49   : > { %1077 = vmatmul.mubr.bf16.gmra.mrb[8].mxu0 %v482_v10  ;;  %v342_v10 = vld [vmem:[%s4988_s0 + $0x310] sm:$0xff] }
  0x4a   : > { %1084 = vmatprep.mubr.bf16.mxu0 %v490_v12  ;;  %3013 = vmatpush3.bf16.msra.mxu0 %v3320_v43  ;;  %v349_v12 = vld [vmem:[%s4988_s0 + $0x348] sm:$0xff]  ;;  %v379_v43 = vld [vmem:[%s4988_s0 + $0x438] sm:$0xff] }
  0x4b   : > { %1238 = vmatmul.mubr.bf16.gmra.mrb[8].mxu1 %v484_v16  ;;  %3014 = vmatprep.subr.bf16.mxu0 %v3322_v52  ;;  %v517_v16 = vpack.c.bf16 %v349_v12, %v342_v10  ;;  %v533_v47 = vpack.c.bf16 %v379_v43, %v372_v42  ;;  %v406_v52 = vld [vmem:[%s4988_s0 + $0x510] sm:$0xff]  ;;  %v419_v10 = vld [vmem:[%s4988_s0 + $0x578] sm:$0xff]  ;;  %v464_v42 = vld [vmem:[%s4988_s0 + $0x6e0] sm:$0xff] }
  0x4c   : > { %1245 = vmatprep.mubr.bf16.mxu1 %v492_v17  ;;  %v344_v17 = vld [vmem:[%s4988_s0 + $0x320] sm:$0xff]  ;;  %v434_v12 = vld [vmem:[%s4988_s0 + $0x5f0] sm:$0xff] }
  0x4d   : > { %v519_v23 = vpack.c.bf16 %v351_v18, %v344_v17  ;;  %v429_v17 = vld [vmem:[%s4988_s0 + $0x5c8] sm:$0xff]  ;;  %v436_v18 = vld [vmem:[%s4988_s0 + $0x600] sm:$0xff] }
  0x4e   : > { %3015 = vmatpush3.bf16.msra.mxu0 %v3323_v58  ;;  %v546_v58 = vpack.c.bf16 %v406_v52, %v399_v51  ;;  %v463_v51 = vld [vmem:[%s4988_s0 + $0x6d8] sm:$0xff] }
  0x4f   : > { %3016 = vmatprep.subr.bf16.mxu0 %v3324_v3  ;;  %v407_v3 = vld [vmem:[%s4988_s0 + $0x518] sm:$0xff] }
  0x50   : > { %v547_v7 = vpack.c.bf16 %v407_v3, %v400_v2  ;;  %v285_v2 = vld [vmem:[%s4988_s0 + $0x148] sm:$0xff] }
  0x51   : > { %1085 = vmatmul.mubr.bf16.gmra.mrb[12].mxu0 %v489_v24  ;;  %v527_v24 = vpack.c.bf16 %v366_v22, %v359_v21  ;;  %v426_v21 = vld [vmem:[%s4988_s0 + $0x5b0] sm:$0xff]  ;;  %v433_v22 = vld [vmem:[%s4988_s0 + $0x5e8] sm:$0xff] }
  0x52   : > { %1092 = vmatprep.mubr.bf16.mxu0 %v497_v28  ;;  %3017 = vmatpush3.bf16.msra.mxu0 %v3325_v5  ;;  %v378_v28 = vld [vmem:[%s4988_s0 + $0x430] sm:$0xff]  ;;  %v415_v5 = vld [vmem:[%s4988_s0 + $0x558] sm:$0xff]  ;;  %v559_v25 = vpack.c.bf16 %v433_v22, %v426_v21  ;;  %v320_v22 = vld [vmem:[%s4988_s0 + $0x260] sm:$0xff] }
  0x53   : > { %1246 = vmatmul.mubr.bf16.gmra.mrb[12].mxu1 %v491_v30  ;;  %3018 = vmatprep.subr.bf16.mxu0 %v3326_v15  ;;  %v358_v30 = vld [vmem:[%s4988_s0 + $0x390] sm:$0xff]  ;;  %v532_v32 = vpack.c.bf16 %v378_v28, %v371_v27  ;;  %v421_v15 = vld [vmem:[%s4988_s0 + $0x588] sm:$0xff]  ;;  %v435_v27 = vld [vmem:[%s4988_s0 + $0x5f8] sm:$0xff] }
  0x54   : > { %1253 = vmatprep.mubr.bf16.mxu1 %v499_v31  ;;  %v365_v31 = vld [vmem:[%s4988_s0 + $0x3c8] sm:$0xff] }
  0x55   : > { %v526_v35 = vpack.c.bf16 %v365_v31, %v358_v30  ;;  %v450_v30 = vld [vmem:[%s4988_s0 + $0x670] sm:$0xff]  ;;  %v561_v31 = vpack.c.bf16 %v435_v27, %v428_v26  ;;  %v341_v26 = vld [vmem:[%s4988_s0 + $0x308] sm:$0xff] }
  0x56   : > { %3019 = vmatpush3.bf16.msra.mxu0 %v3327_v19  ;;  %v554_v19 = vpack.c.bf16 %v421_v15, %v414_v14  ;;  %v313_v14 = vld [vmem:[%s4988_s0 + $0x228] sm:$0xff] }
  0x59   : > { %1093 = vmatmul.mubr.bf16.gmra.mrb[16].mxu0 %v496_v38  ;;  %v377_v38 = vld [vmem:[%s4988_s0 + $0x428] sm:$0xff] }
  0x5a   : > { %1100 = vmatprep.mubr.bf16.mxu0 %v504_v40  ;;  %v392_v40 = vld [vmem:[%s4988_s0 + $0x4a0] sm:$0xff]  ;;  %v531_v41 = vpack.c.bf16 %v377_v38, %v370_v37  ;;  %v566_v37 = vpack.c.bf16 %v447_v34, %v440_v33  ;;  %v442_v38 = vld [vmem:[%s4988_s0 + $0x630] sm:$0xff] }
  0x5b   : > { %1254 = vmatmul.mubr.bf16.gmra.mrb[16].mxu1 %v498_v45  ;;  %v539_v44 = vpack.c.bf16 %v392_v40, %v385_v39  ;;  %v387_v45 = vld [vmem:[%s4988_s0 + $0x478] sm:$0xff]  ;;  %v449_v39 = vld [vmem:[%s4988_s0 + $0x668] sm:$0xff]  ;;  %v348_v34 = vld [vmem:[%s4988_s0 + $0x340] sm:$0xff] }
  0x5c   : > { %1261 = vmatprep.mubr.bf16.mxu1 %v506_v46  ;;  %v394_v46 = vld [vmem:[%s4988_s0 + $0x4b0] sm:$0xff]  ;;  %v568_v43 = vpack.c.bf16 %v449_v39, %v442_v38  ;;  %v369_v38 = vld [vmem:[%s4988_s0 + $0x3e8] sm:$0xff] }
  0x5d   : > { %v541_v48 = vpack.c.bf16 %v394_v46, %v387_v45  ;;  %v454_v45 = vld [vmem:[%s4988_s0 + $0x690] sm:$0xff]  ;;  %v461_v46 = vld [vmem:[%s4988_s0 + $0x6c8] sm:$0xff] }
  0x5e   : > { %v573_v49 = vpack.c.bf16 %v461_v46, %v454_v45  ;;  %v376_v46 = vld [vmem:[%s4988_s0 + $0x420] sm:$0xff] }
  0x61   : > { %1101 = vmatmul.mubr.bf16.gmra.mrb[20].mxu0 %v503_v53  ;;  %v386_v53 = vld [vmem:[%s4988_s0 + $0x470] sm:$0xff] }
  0x62   : > { %1108 = vmatprep.mubr.bf16.mxu0 %v511_v56  ;;  %v401_v56 = vld [vmem:[%s4988_s0 + $0x4e8] sm:$0xff] }
  0x63   : > { %1262 = vmatmul.mubr.bf16.gmra.mrb[20].mxu1 %v505_v59  ;;  %v540_v59 = vpack.c.bf16 %v393_v55, %v386_v53  ;;  %v250_v53 = vld [vmem:[%s4988_s0 + $0x30] sm:$0xff]  ;;  %v575_v55 = vpack.c.bf16 %v463_v51, %v456_v50  ;;  %v397_v50 = vld [vmem:[%s4988_s0 + $0x4c8] sm:$0xff] }
  0x64   : > { %1269 = vmatprep.mubr.bf16.mxu1 %v513_v60  ;;  %v548_v60 = vpack.c.bf16 %v408_v57, %v401_v56  ;;  %v248_v57 = vld [vmem:[%s4988_s0 + $0x20] sm:$0xff] }
  0x69   : > { %1109 = vmatmul.mubr.bf16.gmra.mrb[24].mxu0 %v510_v4  ;;  %v553_v4 = vpack.c.bf16 %v420_v0, %v413_v63  ;;  %v271_v63 = vld [vmem:[%s4988_s0 + $0xd8] sm:$0xff] }
  0x6a   : > { %1116 = vmatprep.mubr.bf16.mxu0 %v518_v6  ;;  %v422_v6 = vld [vmem:[%s4988_s0 + $0x590] sm:$0xff]  ;;  %v481_v3 = vpack.c.bf16 %v271_v63, %v264_v62  ;;  %v425_v62 = vld [vmem:[%s4988_s0 + $0x5a8] sm:$0xff] }
  0x6b   : > { %1270 = vmatmul.mubr.bf16.gmra.mrb[24].mxu1 %v512_v9  ;;  %v555_v8 = vpack.c.bf16 %v422_v6, %v415_v5  ;;  %v412_v9 = vld [vmem:[%s4988_s0 + $0x540] sm:$0xff]  ;;  %v262_v5 = vld [vmem:[%s4988_s0 + $0x90] sm:$0xff]  ;;  %v269_v6 = vld [vmem:[%s4988_s0 + $0xc8] sm:$0xff] }
  0x6c   : > { %1277 = vmatprep.mubr.bf16.mxu1 %v520_v11  ;;  %v427_v11 = vld [vmem:[%s4988_s0 + $0x5b8] sm:$0xff]  ;;  %v552_v13 = vpack.c.bf16 %v419_v10, %v412_v9  ;;  %v479_v9 = vpack.c.bf16 %v269_v6, %v262_v5  ;;  %v292_v10 = vld [vmem:[%s4988_s0 + $0x180] sm:$0xff] }
  0x6d   : > { %v432_v6 = vld [vmem:[%s4988_s0 + $0x5e0] sm:$0xff] }
  0x71   : > { %1117 = vmatmul.mubr.bf16.gmra.mrb[28].mxu0 %v517_v16  ;;  %v560_v16 = vpack.c.bf16 %v434_v12, %v427_v11  ;;  %v299_v11 = vld [vmem:[%s4988_s0 + $0x1b8] sm:$0xff] }
  0x72   : > { %1124 = vmatprep.mubr.bf16.mxu0 %v525_v20  ;;  %v562_v20 = vpack.c.bf16 %v436_v18, %v429_v17  ;;  %v495_v15 = vpack.c.bf16 %v299_v11, %v292_v10  ;;  %v276_v17 = vld [vmem:[%s4988_s0 + $0x100] sm:$0xff]  ;;  %v283_v18 = vld [vmem:[%s4988_s0 + $0x138] sm:$0xff]  ;;  %v453_v10 = vld [vmem:[%s4988_s0 + $0x688] sm:$0xff] }
  0x73   : > { %1278 = vmatmul.mubr.bf16.gmra.mrb[28].mxu1 %v519_v23  ;;  %v441_v23 = vld [vmem:[%s4988_s0 + $0x628] sm:$0xff]  ;;  %v486_v21 = vpack.c.bf16 %v283_v18, %v276_v17  ;;  %v460_v18 = vld [vmem:[%s4988_s0 + $0x6c0] sm:$0xff] }
  0x74   : > { %1285 = vmatprep.mubr.bf16.mxu1 %v527_v24  ;;  %v448_v24 = vld [vmem:[%s4988_s0 + $0x660] sm:$0xff] }
  0x75   : > { %v567_v28 = vpack.c.bf16 %v448_v24, %v441_v23  ;;  %v327_v23 = vld [vmem:[%s4988_s0 + $0x298] sm:$0xff] }
  0x76   : > { %v509_v27 = vpack.c.bf16 %v327_v23, %v320_v22  ;;  %v360_v22 = vld [vmem:[%s4988_s0 + $0x3a0] sm:$0xff]  ;;  %v367_v23 = vld [vmem:[%s4988_s0 + $0x3d8] sm:$0xff] }
  0x79   : > { %1125 = vmatmul.mubr.bf16.gmra.mrb[32].mxu0 %v524_v29  ;;  %v443_v29 = vld [vmem:[%s4988_s0 + $0x638] sm:$0xff] }
  0x7a   : > { %1132 = vmatprep.mubr.bf16.mxu0 %v532_v32  ;;  %v569_v32 = vpack.c.bf16 %v450_v30, %v443_v29  ;;  %v290_v29 = vld [vmem:[%s4988_s0 + $0x170] sm:$0xff]  ;;  %v297_v30 = vld [vmem:[%s4988_s0 + $0x1a8] sm:$0xff] }
  0x7b   : > { %1286 = vmatmul.mubr.bf16.gmra.mrb[32].mxu1 %v526_v35  ;;  %v455_v35 = vld [vmem:[%s4988_s0 + $0x698] sm:$0xff]  ;;  %v493_v33 = vpack.c.bf16 %v297_v30, %v290_v29  ;;  %v381_v29 = vld [vmem:[%s4988_s0 + $0x448] sm:$0xff] }
  0x7c   : > { %1293 = vmatprep.mubr.bf16.mxu1 %v534_v36  ;;  %v462_v36 = vld [vmem:[%s4988_s0 + $0x6d0] sm:$0xff]  ;;  %v389_v30 = vld [vmem:[%s4988_s0 + $0x488] sm:$0xff] }
  0x7d   : > { %v574_v40 = vpack.c.bf16 %v462_v36, %v455_v35  ;;  %v355_v35 = vld [vmem:[%s4988_s0 + $0x378] sm:$0xff] }
  0x7e   : > { %v523_v39 = vpack.c.bf16 %v355_v35, %v348_v34  ;;  %v3328_v34 = vld [vmem:[%s4991_s3] sm:$0xff]  }
  0x7f   : > { %v388_v35 = vld [vmem:[%s4988_s0 + $0x480] sm:$0xff]  ;;  %3191 = vmatprep.subr.bf16.mxu1 %v3328_v34 }
  0x81   : > { %1133 = vmatmul.mubr.bf16.gmra.mrb[36].mxu0 %v531_v41  ;;  %v457_v41 = vld [vmem:[%s4988_s0 + $0x6a8] sm:$0xff] }
  0x82   : > { %1140 = vmatprep.mubr.bf16.mxu0 %v539_v44  ;;  %v576_v44 = vpack.c.bf16 %v464_v42, %v457_v41  ;;  %v304_v41 = vld [vmem:[%s4988_s0 + $0x1e0] sm:$0xff]  ;;  %v311_v42 = vld [vmem:[%s4988_s0 + $0x218] sm:$0xff] }
  0x83   : > { %1294 = vmatmul.mubr.bf16.gmra.mrb[36].mxu1 %v533_v47  ;;  %v249_v47 = vld [vmem:[%s4988_s0 + $0x28] sm:$0xff]  ;;  %v500_v45 = vpack.c.bf16 %v311_v42, %v304_v41  ;;  %v3330_v42 = vld [vmem:[%s4991_s3 + $0x10] sm:$0xff]  }
  0x84   : > { %1301 = vmatprep.mubr.bf16.mxu1 %v541_v48  ;;  %v256_v48 = vld [vmem:[%s4988_s0 + $0x60] sm:$0xff] }
  0x85   : > { %v473_v52 = vpack.c.bf16 %v256_v48, %v249_v47  ;;  %v383_v47 = vld [vmem:[%s4988_s0 + $0x458] sm:$0xff] }
  0x86   : > { %v537_v51 = vpack.c.bf16 %v383_v47, %v376_v46  ;;  %v424_v46 = vld [vmem:[%s4988_s0 + $0x5a0] sm:$0xff] }
  0x89   : > { %1141 = vmatmul.mubr.bf16.gmra.mrb[40].mxu0 %v538_v54  ;;  %v257_v54 = vld [vmem:[%s4988_s0 + $0x68] sm:$0xff] }
  0x8a   : > { %1148 = vmatprep.mubr.bf16.mxu0 %v546_v58  ;;  %v474_v56 = vpack.c.bf16 %v257_v54, %v250_v53  ;;  %v255_v58 = vld [vmem:[%s4988_s0 + $0x58] sm:$0xff]  ;;  %v318_v53 = vld [vmem:[%s4988_s0 + $0x250] sm:$0xff]  ;;  %v325_v54 = vld [vmem:[%s4988_s0 + $0x288] sm:$0xff] }
  0x8b   : > { %1302 = vmatmul.mubr.bf16.gmra.mrb[40].mxu1 %v540_v59  ;;  %v263_v59 = vld [vmem:[%s4988_s0 + $0x98] sm:$0xff]  ;;  %v472_v61 = vpack.c.bf16 %v255_v58, %v248_v57  ;;  %v507_v57 = vpack.c.bf16 %v325_v54, %v318_v53  ;;  %v404_v58 = vld [vmem:[%s4988_s0 + $0x500] sm:$0xff] }
  0x8c   : > { %1309 = vmatprep.mubr.bf16.mxu1 %v548_v60  ;;  %v270_v60 = vld [vmem:[%s4988_s0 + $0xd0] sm:$0xff] }
  0x8d   : > { %v480_v0 = vpack.c.bf16 %v270_v60, %v263_v59  ;;  %v411_v59 = vld [vmem:[%s4988_s0 + $0x538] sm:$0xff] }
  0x8e   : > { %v551_v63 = vpack.c.bf16 %v411_v59, %v404_v58 }
  0x91   : > { %1149 = vmatmul.mubr.bf16.gmra.mrb[44].mxu0 %v545_v1  ;;  %v278_v1 = vld [vmem:[%s4988_s0 + $0x110] sm:$0xff] }
  0x92   : > { %1156 = vmatprep.mubr.bf16.mxu0 %v553_v4  ;;  %v488_v4 = vpack.c.bf16 %v285_v2, %v278_v1  ;;  %v332_v1 = vld [vmem:[%s4988_s0 + $0x2c0] sm:$0xff]  ;;  %v339_v2 = vld [vmem:[%s4988_s0 + $0x2f8] sm:$0xff] }
  0x93   : > { %1310 = vmatmul.mubr.bf16.gmra.mrb[44].mxu1 %v547_v7  ;;  %v277_v7 = vld [vmem:[%s4988_s0 + $0x108] sm:$0xff]  ;;  %v514_v5 = vpack.c.bf16 %v339_v2, %v332_v1  ;;  %v416_v1 = vld [vmem:[%s4988_s0 + $0x560] sm:$0xff]  ;;  %v423_v2 = vld [vmem:[%s4988_s0 + $0x598] sm:$0xff] }
  0x94   : > { %1317 = vmatprep.mubr.bf16.mxu1 %v555_v8  ;;  %v284_v8 = vld [vmem:[%s4988_s0 + $0x140] sm:$0xff] }
  0x95   : > { %v487_v12 = vpack.c.bf16 %v284_v8, %v277_v7  ;;  %v439_v7 = vld [vmem:[%s4988_s0 + $0x618] sm:$0xff] }
  0x96   : > { %v565_v11 = vpack.c.bf16 %v439_v7, %v432_v6  ;;  %v438_v6 = vld [vmem:[%s4988_s0 + $0x610] sm:$0xff] }
  0x99   : > { %1157 = vmatmul.mubr.bf16.gmra.mrb[48].mxu0 %v552_v13  ;;  %v306_v13 = vld [vmem:[%s4988_s0 + $0x1f0] sm:$0xff] }
  0x9a   : > { %1164 = vmatprep.mubr.bf16.mxu0 %v560_v16  ;;  %v502_v16 = vpack.c.bf16 %v313_v14, %v306_v13  ;;  %v346_v13 = vld [vmem:[%s4988_s0 + $0x330] sm:$0xff]  ;;  %v353_v14 = vld [vmem:[%s4988_s0 + $0x368] sm:$0xff] }
  0x9b   : > { %1318 = vmatmul.mubr.bf16.gmra.mrb[48].mxu1 %v554_v19  ;;  %v291_v19 = vld [vmem:[%s4988_s0 + $0x178] sm:$0xff]  ;;  %v521_v17 = vpack.c.bf16 %v353_v14, %v346_v13 }
  0x9c   : > { %1325 = vmatprep.mubr.bf16.mxu1 %v562_v20  ;;  %v298_v20 = vld [vmem:[%s4988_s0 + $0x1b0] sm:$0xff] }
  0x9d   : > { %v494_v24 = vpack.c.bf16 %v298_v20, %v291_v19  ;;  %v467_v19 = vld [vmem:[%s4988_s0 + $0x6f8] sm:$0xff] }
  0xa1   : > { %1165 = vmatmul.mubr.bf16.gmra.mrb[52].mxu0 %v559_v25  ;;  %v334_v25 = vld [vmem:[%s4988_s0 + $0x2d0] sm:$0xff] }
  0xa2   : > { %1172 = vmatprep.mubr.bf16.mxu0 %v567_v28  ;;  %v516_v28 = vpack.c.bf16 %v341_v26, %v334_v25  ;;  %v382_v25 = vld [vmem:[%s4988_s0 + $0x450] sm:$0xff]  ;;  %v528_v26 = vpack.c.bf16 %v367_v23, %v360_v22 }
  0xa3   : > { %1326 = vmatmul.mubr.bf16.gmra.mrb[52].mxu1 %v561_v31  ;;  %v305_v31 = vld [vmem:[%s4988_s0 + $0x1e8] sm:$0xff]  ;;  %v3334_v22 = vld [vmem:[%s4991_s3 + $0x30] sm:$0xff]  }
  0xa4   : > { %1333 = vmatprep.mubr.bf16.mxu1 %v569_v32  ;;  %v312_v32 = vld [vmem:[%s4988_s0 + $0x220] sm:$0xff] }
  0xa5   : > { %v501_v36 = vpack.c.bf16 %v312_v32, %v305_v31  ;;  %v396_v31 = vld [vmem:[%s4988_s0 + $0x4c0] sm:$0xff] }
  0xa9   : > { %1173 = vmatmul.mubr.bf16.gmra.mrb[56].mxu0 %v566_v37  ;;  %v362_v37 = vld [vmem:[%s4988_s0 + $0x3b0] sm:$0xff] }
  0xaa   : > { %1180 = vmatprep.mubr.bf16.mxu0 %v574_v40  ;;  %v530_v40 = vpack.c.bf16 %v369_v38, %v362_v37  ;;  %v403_v37 = vld [vmem:[%s4988_s0 + $0x4f8] sm:$0xff]  ;;  %v410_v38 = vld [vmem:[%s4988_s0 + $0x530] sm:$0xff] }
  0xab   : > { %1334 = vmatmul.mubr.bf16.gmra.mrb[56].mxu1 %v568_v43  ;;  %v319_v43 = vld [vmem:[%s4988_s0 + $0x258] sm:$0xff]  ;;  %v550_v41 = vpack.c.bf16 %v410_v38, %v403_v37 }
  0xac   : > { %1341 = vmatprep.mubr.bf16.mxu1 %v576_v44  ;;  %v326_v44 = vld [vmem:[%s4988_s0 + $0x290] sm:$0xff] }
  0xad   : > { %v508_v48 = vpack.c.bf16 %v326_v44, %v319_v43  ;;  %v402_v43 = vld [vmem:[%s4988_s0 + $0x4f0] sm:$0xff]  ;;  %v409_v44 = vld [vmem:[%s4988_s0 + $0x528] sm:$0xff] }
  0xb1   : > { %1181 = vmatmul.mubr.bf16.gmra.mrb[60].mxu0 %v573_v49  ;;  %v390_v49 = vld [vmem:[%s4988_s0 + $0x490] sm:$0xff] }
  0xb2   : > { %1382 = vmatprep.mubr.bf16.mxu0 %v473_v52  ;;  %v544_v52 = vpack.c.bf16 %v397_v50, %v390_v49  ;;  %v549_v50 = vpack.c.bf16 %v409_v44, %v402_v43 }
  0xb3   : > { %1342 = vmatmul.mubr.bf16.gmra.mrb[60].mxu1 %v575_v55  ;;  %v333_v55 = vld [vmem:[%s4988_s0 + $0x2c8] sm:$0xff] }
  0xb4   : > { %3159 = vmatprep.mubr.msk.bf16.mxu1 %vm979_vm0, %v474_v56  ;;  %v340_v56 = vld [vmem:[%s4988_s0 + $0x300] sm:$0xff] }
  0xb5   : > { %v515_v60 = vpack.c.bf16 %v340_v56, %v333_v55 }
  0xb9   : > { %1383 = vmatmul.mubr.bf16.vlgmr.msra.gmra.mrb[64].mxu0 %v472_v61  ;;  %v418_v61 = vld [vmem:[%s4988_s0 + $0x570] sm:$0xff] }
  0xba   : > { %1390 = vmatprep.mubr.bf16.mxu0 %v480_v0  ;;  %v558_v0 = vpack.c.bf16 %v425_v62, %v418_v61  ;;  %v3332_v62 = vld [vmem:[%s4991_s3 + $0x20] sm:$0xff]  }
  0xbb   : > { %3160 = vmatmul.mubr.msk.bf16.vlgmr.msra.gmra.mrb[64].mxu1 %vm979_vm0, %v481_v3  ;;  %v347_v3 = vld [vmem:[%s4988_s0 + $0x338] sm:$0xff] }
  0xbc   : > { %3163 = vmatprep.mubr.msk.bf16.mxu1 %vm979_vm0, %v488_v4  ;;  %v354_v4 = vld [vmem:[%s4988_s0 + $0x370] sm:$0xff]  ;;  %3192 = vmatpush3.bf16.msra.mxu1 %v3328_v34 }
  0xbd   : > { %v522_v8 = vpack.c.bf16 %v354_v4, %v347_v3 }
  0xc1   : > { %1391 = vmatmul.mubr.bf16.gmra.mrb[68].mxu0 %v479_v9  ;;  %v446_v9 = vld [vmem:[%s4988_s0 + $0x650] sm:$0xff] }
  0xc2   : > { %1398 = vmatprep.mubr.bf16.mxu0 %v487_v12  ;;  %v572_v12 = vpack.c.bf16 %v453_v10, %v446_v9  ;;  %v556_v10 = vpack.c.bf16 %v423_v2, %v416_v1 }
  0xc3   : > { %3164 = vmatmul.mubr.msk.bf16.gmra.mrb[68].mxu1 %vm979_vm0, %v495_v15  ;;  %v361_v15 = vld [vmem:[%s4988_s0 + $0x3a8] sm:$0xff] }
  0xc4   : > { %3167 = vmatprep.mubr.msk.bf16.mxu1 %vm979_vm0, %v502_v16  ;;  %v368_v16 = vld [vmem:[%s4988_s0 + $0x3e0] sm:$0xff] }
  0xc5   : > { %v529_v20 = vpack.c.bf16 %v368_v16, %v361_v15 }
  0xc9   : > { %1399 = vmatmul.mubr.bf16.gmra.mrb[72].mxu0 %v486_v21  ;;  %v579_v21 = vpack.c.bf16 %v467_v19, %v460_v18 }
  0xca   : > { %1406 = vmatprep.mubr.bf16.mxu0 %v494_v24  ;;  %v375_v24 = vld [vmem:[%s4988_s0 + $0x418] sm:$0xff] }
  0xcb   : > { %3168 = vmatmul.mubr.msk.bf16.gmra.mrb[72].mxu1 %vm979_vm0, %v509_v27  ;;  %v536_v27 = vpack.c.bf16 %v382_v25, %v375_v24  ;;  %v430_v25 = vld [vmem:[%s4988_s0 + $0x5d0] sm:$0xff] }
  0xcc   : > { %3171 = vmatprep.mubr.msk.bf16.mxu1 %vm979_vm0, %v516_v28  ;;  %v374_v28 = vld [vmem:[%s4988_s0 + $0x410] sm:$0xff] }
  0xcd   : > { %v535_v32 = vpack.c.bf16 %v381_v29, %v374_v28  ;;  %v445_v29 = vld [vmem:[%s4988_s0 + $0x648] sm:$0xff] }
  0xd1   : > { %1407 = vmatmul.mubr.bf16.gmra.mrb[76].mxu0 %v493_v33  ;;  %v543_v33 = vpack.c.bf16 %v396_v31, %v389_v30  ;;  %v452_v30 = vld [vmem:[%s4988_s0 + $0x680] sm:$0xff] }
  0xd2   : > { %1414 = vmatprep.mubr.bf16.mxu0 %v501_v36  ;;  %v395_v36 = vld [vmem:[%s4988_s0 + $0x4b8] sm:$0xff]  ;;  %v571_v38 = vpack.c.bf16 %v452_v30, %v445_v29 }
  0xd3   : > { %3172 = vmatmul.mubr.msk.bf16.gmra.mrb[76].mxu1 %vm979_vm0, %v523_v39  ;;  %v542_v39 = vpack.c.bf16 %v395_v36, %v388_v35  ;;  %v3335_v35 = vld [vmem:[%s4991_s3 + $0x38] sm:$0xff]  }
  0xd4   : > { %3175 = vmatprep.mubr.msk.bf16.mxu1 %vm979_vm0, %v530_v40  ;;  %v3329_v40 = vld [vmem:[%s4991_s3 + $0x8] sm:$0xff]  }
  0xd5   : > { %3193 = vmatprep.subr.bf16.mxu1 %v3329_v40 }
  0xd6   : > { %3194 = vmatpush3.bf16.msra.mxu1 %v3329_v40 }
  0xd7   : > { %3195 = vmatprep.subr.bf16.mxu1 %v3330_v42 }
  0xd9   : > { %1415 = vmatmul.mubr.bf16.gmra.mrb[80].mxu0 %v500_v45  ;;  %v417_v45 = vld [vmem:[%s4988_s0 + $0x568] sm:$0xff] }
  0xda   : > { %1422 = vmatprep.mubr.bf16.mxu0 %v508_v48  ;;  %3196 = vmatpush3.bf16.msra.mxu1 %v3330_v42  ;;  %v4381_v48 = vld [vmem:[%s4990_s2] ss:$0 sm:$0xff]  ;;  %v557_v54 = vpack.c.bf16 %v424_v46, %v417_v45 }
  0xdb   : > { %3176 = vmatmul.mubr.msk.bf16.gmra.mrb[80].mxu1 %vm979_vm0, %v537_v51  ;;  %v3331_v51 = vld [vmem:[%s4991_s3 + $0x18] sm:$0xff]  }
  0xdc   : > { %3179 = vmatprep.mubr.msk.bf16.mxu1 %vm979_vm0, %v544_v52  ;;  %3197 = vmatprep.subr.bf16.mxu1 %v3331_v51 }
  0xde   : > { %3198 = vmatpush3.bf16.msra.mxu1 %v3331_v51 }
  0xdf   : > { %3199 = vmatprep.subr.bf16.mxu1 %v3332_v62 }
  0xe1   : > { %1423 = vmatmul.mubr.bf16.gmra.mrb[84].mxu0 %v507_v57 }
  0xe2   : > { %1430 = vmatprep.mubr.bf16.mxu0 %v515_v60  ;;  %3200 = vmatpush3.bf16.msra.mxu1 %v3332_v62 }
  0xe3   : > { %3180 = vmatmul.mubr.msk.bf16.gmra.mrb[84].mxu1 %vm979_vm0, %v551_v63 }
  0xe4   : > { %3183 = vmatprep.mubr.msk.bf16.mxu1 %vm979_vm0, %v558_v0 }
  0xe9   : > { %1431 = vmatmul.mubr.bf16.gmra.mrb[88].mxu0 %v514_v5  ;;  %v431_v5 = vld [vmem:[%s4988_s0 + $0x5d8] sm:$0xff] }
  0xea   : > { %1438 = vmatprep.mubr.bf16.mxu0 %v522_v8  ;;  %v564_v14 = vpack.c.bf16 %v438_v6, %v431_v5 }
  0xeb   : > { %3184 = vmatmul.mubr.msk.bf16.gmra.mrb[88].mxu1 %vm979_vm0, %v565_v11  ;;  %v3333_v11 = vld [vmem:[%s4991_s3 + $0x28] sm:$0xff]  }
  0xec   : > { %3187 = vmatprep.mubr.msk.bf16.mxu1 %vm979_vm0, %v572_v12  ;;  %3201 = vmatprep.subr.bf16.mxu1 %v3333_v11 }
  0xed   : > { %3202 = vmatpush3.bf16.msra.mxu1 %v3333_v11 }
  0xee   : > { %3203 = vmatprep.subr.bf16.mxu1 %v3334_v22 }
  0xf1   : > { %1439 = vmatmul.mubr.bf16.gmra.mrb[92].mxu0 %v521_v17  ;;  %3204 = vmatpush3.bf16.msra.mxu1 %v3334_v22 }
  0xf2   : > { %1446 = vmatprep.mubr.bf16.mxu0 %v529_v20  ;;  %3205 = vmatprep.subr.bf16.mxu1 %v3335_v35 }
  0xf3   : > { %3188 = vmatmul.mubr.msk.bf16.gmra.mrb[92].mxu1 %vm979_vm0, %v579_v21 }
  0xf5   : > { %3206 = vmatpush3.bf16.msra.mxu1 %v3335_v35 }
  0xf9   : > { %1447 = vmatmul.mubr.bf16.gmra.mrb[96].mxu0 %v528_v26  ;;  %v437_v26 = vld [vmem:[%s4988_s0 + $0x608] sm:$0xff] }
  0xfa   : > { %1454 = vmatprep.mubr.bf16.mxu0 %v536_v27  ;;  %v563_v34 = vpack.c.bf16 %v437_v26, %v430_v25 }
 0x101   : > { %1455 = vmatmul.mubr.bf16.gmra.mrb[100].mxu0 %v535_v32 }
 0x102   : > { %1462 = vmatprep.mubr.bf16.mxu0 %v543_v33 }
 0x109   : > { %1463 = vmatmul.mubr.bf16.gmra.mrb[104].mxu0 %v542_v39 }
 0x10a   : > { %1470 = vmatprep.mubr.bf16.mxu0 %v550_v41 }
 0x10c   : > { %v2796_v47 = vpop.f32.mrb[0].mxu0 }
 0x10d   : > { %v2797_v49 = vpop.f32.mrb[1].mxu0 }
 0x10e   : > { %v2798_v52 = vadd.f32 %v2797_v49, %v2796_v47  ;;  %v2799_v53 = vpop.f32.mrb[2].mxu0  ;;  %v2908_v55 = vpop.f32.mrb[0].mxu1  ;;  %v444_v49 = vld [vmem:[%s4988_s0 + $0x640] sm:$0xff] }
 0x10f   : > { %v2800_v56 = vpop.f32.mrb[3].mxu0  ;;  %v2909_v59 = vpop.f32.mrb[1].mxu1 }
 0x110   : > { %v1063_v57 = vadd.f32 %v2798_v52, %v4381_v48  ;;  %v2801_v58 = vadd.f32 %v2800_v56, %v2799_v53  ;;  %v2910_v60 = vadd.f32 %v2909_v59, %v2908_v55  ;;  %v2911_v61 = vpop.f32.mrb[2].mxu1  ;;  %v459_v53 = vld [vmem:[%s4988_s0 + $0x6b8] sm:$0xff] }
 0x111   : > { %1471 = vmatmul.mubr.bf16.gmra.mrb[108].mxu0 %v549_v50  ;;  %v2912_v0 = vpop.f32.mrb[3].mxu1  ;;  %v451_v50 = vld [vmem:[%s4988_s0 + $0x678] sm:$0xff] }
 0x112   : > { %v1066_v63 = vadd.f32 %v2801_v58, %v4381_v48  ;;  %1478 = vmatprep.mubr.bf16.mxu0 %v557_v54  ;;  %v4397_v3 = vadd.f32 %v2910_v60, %v1063_v57  ;;  %v2913_v4 = vadd.f32 %v2912_v0, %v2911_v61  ;;  %v466_v54 = vld [vmem:[%s4988_s0 + $0x6f0] sm:$0xff]  ;;  %v570_v58 = vpack.c.bf16 %v451_v50, %v444_v49 }
 0x113   : > { %v578_v61 = vpack.c.bf16 %v466_v54, %v459_v53 }
 0x114   : > { %v2802_v7 = vpop.f32.mrb[4].mxu0  ;;  %v4405_v8 = vadd.f32 %v2913_v4, %v1066_v63 }
 0x115   : > { %v2803_v9 = vpop.f32.mrb[5].mxu0 }
 0x116   : > { %v2804_v12 = vadd.f32 %v2803_v9, %v2802_v7  ;;  %v2805_v13 = vpop.f32.mrb[6].mxu0  ;;  %v2914_v15 = vpop.f32.mrb[4].mxu1  ;;  %v458_v9 = vld [vmem:[%s4988_s0 + $0x6b0] sm:$0xff] }
 0x117   : > { %v2806_v16 = vpop.f32.mrb[7].mxu0  ;;  %v2915_v19 = vpop.f32.mrb[5].mxu1 }
 0x118   : > { %v1071_v17 = vadd.f32 %v2804_v12, %v4381_v48  ;;  %v2807_v18 = vadd.f32 %v2806_v16, %v2805_v13  ;;  %v2916_v20 = vadd.f32 %v2915_v19, %v2914_v15  ;;  %v2917_v21 = vpop.f32.mrb[6].mxu1 }
 0x119   : > { %1479 = vmatmul.mubr.bf16.gmra.mrb[112].mxu0 %v556_v10  ;;  %v2918_v24 = vpop.f32.mrb[7].mxu1  ;;  %v465_v10 = vld [vmem:[%s4988_s0 + $0x6e8] sm:$0xff] }
 0x11a   : > { %v1074_v23 = vadd.f32 %v2807_v18, %v4381_v48  ;;  %1486 = vmatprep.mubr.bf16.mxu0 %v564_v14  ;;  %v4421_v27 = vadd.f32 %v2916_v20, %v1071_v17  ;;  %v2919_v28 = vadd.f32 %v2918_v24, %v2917_v21  ;;  %v577_v16 = vpack.c.bf16 %v465_v10, %v458_v9 }
 0x11c   : > { %v2808_v31 = vpop.f32.mrb[8].mxu0  ;;  %v4429_v32 = vadd.f32 %v2919_v28, %v1074_v23 }
 0x11d   : > { %v2809_v33 = vpop.f32.mrb[9].mxu0 }
 0x11e   : > { %v2810_v36 = vadd.f32 %v2809_v33, %v2808_v31  ;;  %v2811_v37 = vpop.f32.mrb[10].mxu0  ;;  %v2920_v39 = vpop.f32.mrb[8].mxu1 }
 0x11f   : > { %v2812_v40 = vpop.f32.mrb[11].mxu0  ;;  %v2921_v43 = vpop.f32.mrb[9].mxu1 }
 0x120   : > { %v1079_v41 = vadd.f32 %v2810_v36, %v4381_v48  ;;  %v2813_v42 = vadd.f32 %v2812_v40, %v2811_v37  ;;  %v2922_v44 = vadd.f32 %v2921_v43, %v2920_v39  ;;  %v2923_v45 = vpop.f32.mrb[10].mxu1 }
 0x121   : > { %1487 = vmatmul.mubr.bf16.gmra.mrb[116].mxu0 %v563_v34  ;;  %v2924_v47 = vpop.f32.mrb[11].mxu1 }
 0x122   : > { %v1082_v46 = vadd.f32 %v2813_v42, %v4381_v48  ;;  %1494 = vmatprep.mubr.bf16.mxu0 %v571_v38  ;;  %v4442_v51 = vadd.f32 %v2922_v44, %v1079_v41  ;;  %v2925_v52 = vadd.f32 %v2924_v47, %v2923_v45 }
 0x124   : > { %v2814_v55 = vpop.f32.mrb[12].mxu0  ;;  %v4450_v56 = vadd.f32 %v2925_v52, %v1082_v46 }
 0x125   : > { %v2815_v57 = vpop.f32.mrb[13].mxu0 }
 0x126   : > { %v2816_v59 = vadd.f32 %v2815_v57, %v2814_v55  ;;  %v2817_v60 = vpop.f32.mrb[14].mxu0  ;;  %v2926_v62 = vpop.f32.mrb[12].mxu1 }
 0x127   : > { %v2818_v63 = vpop.f32.mrb[15].mxu0  ;;  %v2927_v2 = vpop.f32.mrb[13].mxu1 }
 0x128   : > { %v1087_v0 = vadd.f32 %v2816_v59, %v4381_v48  ;;  %v2819_v1 = vadd.f32 %v2818_v63, %v2817_v60  ;;  %v2928_v4 = vadd.f32 %v2927_v2, %v2926_v62  ;;  %v2929_v5 = vpop.f32.mrb[14].mxu1 }
 0x129   : > { %1495 = vmatmul.mubr.bf16.gmra.mrb[120].mxu0 %v570_v58  ;;  %v2930_v7 = vpop.f32.mrb[15].mxu1 }
 0x12a   : > { %v1090_v6 = vadd.f32 %v2819_v1, %v4381_v48  ;;  %1502 = vmatprep.mubr.bf16.mxu0 %v578_v61  ;;  %v4460_v11 = vadd.f32 %v2928_v4, %v1087_v0  ;;  %v2931_v12 = vadd.f32 %v2930_v7, %v2929_v5 }
 0x12c   : > { %v2820_v13 = vpop.f32.mrb[16].mxu0  ;;  %v4462_v14 = vadd.f32 %v2931_v12, %v1090_v6 }
 0x12d   : > { %v2821_v15 = vpop.f32.mrb[17].mxu0 }
 0x12e   : > { %v2822_v17 = vadd.f32 %v2821_v15, %v2820_v13  ;;  %v2823_v18 = vpop.f32.mrb[18].mxu0  ;;  %v2932_v19 = vpop.f32.mrb[16].mxu1 }
 0x12f   : > { %v2824_v20 = vpop.f32.mrb[19].mxu0  ;;  %v2933_v23 = vpop.f32.mrb[17].mxu1 }
 0x130   : > { %v1095_v21 = vadd.f32 %v2822_v17, %v4381_v48  ;;  %v2825_v22 = vadd.f32 %v2824_v20, %v2823_v18  ;;  %v2934_v24 = vadd.f32 %v2933_v23, %v2932_v19  ;;  %v2935_v25 = vpop.f32.mrb[18].mxu1 }
 0x131   : > { %1503 = vmatmul.mubr.bf16.gmra.mrb[124].mxu0 %v577_v16  ;;  %v2936_v28 = vpop.f32.mrb[19].mxu1 }
 0x132   : > { %v1098_v26 = vadd.f32 %v2825_v22, %v4381_v48  ;;  %v4466_v29 = vadd.f32 %v2934_v24, %v1095_v21  ;;  %v2937_v30 = vadd.f32 %v2936_v28, %v2935_v25 }
 0x134   : > { %v2826_v31 = vpop.f32.mrb[20].mxu0  ;;  %v4468_v33 = vadd.f32 %v2937_v30, %v1098_v26 }
 0x135   : > { %v2827_v34 = vpop.f32.mrb[21].mxu0 }
 0x136   : > { %v2828_v35 = vadd.f32 %v2827_v34, %v2826_v31  ;;  %v2829_v36 = vpop.f32.mrb[22].mxu0  ;;  %v2938_v37 = vpop.f32.mrb[20].mxu1 }
 0x137   : > { %v2830_v38 = vpop.f32.mrb[23].mxu0  ;;  %v2939_v41 = vpop.f32.mrb[21].mxu1 }
 0x138   : > { %v1103_v39 = vadd.f32 %v2828_v35, %v4381_v48  ;;  %v2831_v40 = vadd.f32 %v2830_v38, %v2829_v36  ;;  %v2940_v42 = vadd.f32 %v2939_v41, %v2938_v37  ;;  %v2941_v43 = vpop.f32.mrb[22].mxu1 }
 0x139   : > { %v2942_v45 = vpop.f32.mrb[23].mxu1 }
 0x13a   : > { %v1106_v44 = vadd.f32 %v2831_v40, %v4381_v48  ;;  %v4472_v46 = vadd.f32 %v2940_v42, %v1103_v39  ;;  %v2943_v47 = vadd.f32 %v2942_v45, %v2941_v43 }
 0x13c   : > { %v2832_v49 = vpop.f32.mrb[24].mxu0  ;;  %v4474_v50 = vadd.f32 %v2943_v47, %v1106_v44 }
 0x13d   : > { %v2833_v52 = vpop.f32.mrb[25].mxu0 }
 0x13e   : > { %v2834_v53 = vadd.f32 %v2833_v52, %v2832_v49  ;;  %v2835_v54 = vpop.f32.mrb[26].mxu0  ;;  %v2944_v55 = vpop.f32.mrb[24].mxu1 }
 0x13f   : > { %v2836_v57 = vpop.f32.mrb[27].mxu0  ;;  %v2945_v60 = vpop.f32.mrb[25].mxu1 }
 0x140   : > { %v1111_v58 = vadd.f32 %v2834_v53, %v4381_v48  ;;  %v2837_v59 = vadd.f32 %v2836_v57, %v2835_v54  ;;  %v2946_v61 = vadd.f32 %v2945_v60, %v2944_v55  ;;  %v2947_v62 = vpop.f32.mrb[26].mxu1 }
 0x141   : > { %v2948_v0 = vpop.f32.mrb[27].mxu1 }
 0x142   : > { %v1114_v63 = vadd.f32 %v2837_v59, %v4381_v48  ;;  %v4478_v1 = vadd.f32 %v2946_v61, %v1111_v58  ;;  %v2949_v2 = vadd.f32 %v2948_v0, %v2947_v62 }
 0x144   : > { %v2838_v4 = vpop.f32.mrb[28].mxu0  ;;  %v4480_v5 = vadd.f32 %v2949_v2, %v1114_v63 }
 0x145   : > { %v2839_v6 = vpop.f32.mrb[29].mxu0 }
 0x146   : > { %v2840_v7 = vadd.f32 %v2839_v6, %v2838_v4  ;;  %v2841_v9 = vpop.f32.mrb[30].mxu0  ;;  %v2950_v10 = vpop.f32.mrb[28].mxu1 }
 0x147   : > { %v2842_v12 = vpop.f32.mrb[31].mxu0  ;;  %v2951_v16 = vpop.f32.mrb[29].mxu1 }
 0x148   : > { %v1119_v13 = vadd.f32 %v2840_v7, %v4381_v48  ;;  %v2843_v15 = vadd.f32 %v2842_v12, %v2841_v9  ;;  %v2952_v17 = vadd.f32 %v2951_v16, %v2950_v10  ;;  %v2953_v18 = vpop.f32.mrb[30].mxu1 }
 0x149   : > { %v2954_v20 = vpop.f32.mrb[31].mxu1 }
 0x14a   : > { %v1122_v19 = vadd.f32 %v2843_v15, %v4381_v48  ;;  %v4484_v21 = vadd.f32 %v2952_v17, %v1119_v13  ;;  %v2955_v22 = vadd.f32 %v2954_v20, %v2953_v18 }
 0x14c   : > { %v2844_v23 = vpop.f32.mrb[32].mxu0  ;;  %v4486_v24 = vadd.f32 %v2955_v22, %v1122_v19 }
 0x14d   : > { %v2845_v25 = vpop.f32.mrb[33].mxu0 }
 0x14e   : > { %v2846_v26 = vadd.f32 %v2845_v25, %v2844_v23  ;;  %v2847_v28 = vpop.f32.mrb[34].mxu0  ;;  %v2956_v30 = vpop.f32.mrb[32].mxu1 }
 0x14f   : > { %v2848_v31 = vpop.f32.mrb[35].mxu0  ;;  %v2957_v36 = vpop.f32.mrb[33].mxu1 }
 0x150   : > { %v1127_v34 = vadd.f32 %v2846_v26, %v4381_v48  ;;  %v2849_v35 = vadd.f32 %v2848_v31, %v2847_v28  ;;  %v2958_v37 = vadd.f32 %v2957_v36, %v2956_v30  ;;  %v2959_v38 = vpop.f32.mrb[34].mxu1 }
 0x151   : > { %v2960_v40 = vpop.f32.mrb[35].mxu1 }
 0x152   : > { %v1130_v39 = vadd.f32 %v2849_v35, %v4381_v48  ;;  %v4490_v41 = vadd.f32 %v2958_v37, %v1127_v34  ;;  %v2961_v42 = vadd.f32 %v2960_v40, %v2959_v38 }
 0x154   : > { %v2850_v43 = vpop.f32.mrb[36].mxu0  ;;  %v4492_v44 = vadd.f32 %v2961_v42, %v1130_v39 }
 0x155   : > { %v2851_v45 = vpop.f32.mrb[37].mxu0 }
 0x156   : > { %v2852_v47 = vadd.f32 %v2851_v45, %v2850_v43  ;;  %v2853_v49 = vpop.f32.mrb[38].mxu0  ;;  %v2962_v52 = vpop.f32.mrb[36].mxu1 }
 0x157   : > { %v2854_v53 = vpop.f32.mrb[39].mxu0  ;;  %v2963_v57 = vpop.f32.mrb[37].mxu1 }
 0x158   : > { %v1135_v54 = vadd.f32 %v2852_v47, %v4381_v48  ;;  %v2855_v55 = vadd.f32 %v2854_v53, %v2853_v49  ;;  %v2964_v58 = vadd.f32 %v2963_v57, %v2962_v52  ;;  %v2965_v59 = vpop.f32.mrb[38].mxu1 }
 0x159   : > { %v2966_v61 = vpop.f32.mrb[39].mxu1 }
 0x15a   : > { %v1138_v60 = vadd.f32 %v2855_v55, %v4381_v48  ;;  %v4496_v62 = vadd.f32 %v2964_v58, %v1135_v54  ;;  %v2967_v63 = vadd.f32 %v2966_v61, %v2965_v59 }
 0x15c   : > { %v2856_v0 = vpop.f32.mrb[40].mxu0  ;;  %v4498_v2 = vadd.f32 %v2967_v63, %v1138_v60 }
 0x15d   : > { %v2857_v4 = vpop.f32.mrb[41].mxu0 }
 0x15e   : > { %v2858_v6 = vadd.f32 %v2857_v4, %v2856_v0  ;;  %v2859_v7 = vpop.f32.mrb[42].mxu0  ;;  %v2968_v9 = vpop.f32.mrb[40].mxu1 }
 0x15f   : > { %v2860_v10 = vpop.f32.mrb[43].mxu0  ;;  %v2969_v15 = vpop.f32.mrb[41].mxu1 }
 0x160   : > { %v1143_v12 = vadd.f32 %v2858_v6, %v4381_v48  ;;  %v2861_v13 = vadd.f32 %v2860_v10, %v2859_v7  ;;  %v2970_v16 = vadd.f32 %v2969_v15, %v2968_v9  ;;  %v2971_v17 = vpop.f32.mrb[42].mxu1 }
 0x161   : > { %v2972_v19 = vpop.f32.mrb[43].mxu1 }
 0x162   : > { %v1146_v18 = vadd.f32 %v2861_v13, %v4381_v48  ;;  %v4502_v20 = vadd.f32 %v2970_v16, %v1143_v12  ;;  %v2973_v22 = vadd.f32 %v2972_v19, %v2971_v17 }
 0x164   : > { %v2862_v23 = vpop.f32.mrb[44].mxu0  ;;  %v4504_v25 = vadd.f32 %v2973_v22, %v1146_v18 }
 0x165   : > { %v2863_v26 = vpop.f32.mrb[45].mxu0 }
 0x166   : > { %v2864_v28 = vadd.f32 %v2863_v26, %v2862_v23  ;;  %v2865_v30 = vpop.f32.mrb[46].mxu0  ;;  %v2974_v31 = vpop.f32.mrb[44].mxu1 }
 0x167   : > { %v2866_v34 = vpop.f32.mrb[47].mxu0  ;;  %v2975_v37 = vpop.f32.mrb[45].mxu1 }
 0x168   : > { %v1151_v35 = vadd.f32 %v2864_v28, %v4381_v48  ;;  %v2867_v36 = vadd.f32 %v2866_v34, %v2865_v30  ;;  %v2976_v38 = vadd.f32 %v2975_v37, %v2974_v31  ;;  %v2977_v39 = vpop.f32.mrb[46].mxu1 }
 0x169   : > { %v2978_v42 = vpop.f32.mrb[47].mxu1 }
 0x16a   : > { %v1154_v40 = vadd.f32 %v2867_v36, %v4381_v48  ;;  %v4508_v43 = vadd.f32 %v2976_v38, %v1151_v35  ;;  %v2979_v45 = vadd.f32 %v2978_v42, %v2977_v39 }
 0x16c   : > { %v2868_v47 = vpop.f32.mrb[48].mxu0  ;;  %v4510_v49 = vadd.f32 %v2979_v45, %v1154_v40 }
 0x16d   : > { %v2869_v52 = vpop.f32.mrb[49].mxu0 }
 0x16e   : > { %v2870_v53 = vadd.f32 %v2869_v52, %v2868_v47  ;;  %v2871_v54 = vpop.f32.mrb[50].mxu0  ;;  %v2980_v55 = vpop.f32.mrb[48].mxu1 }
 0x16f   : > { %v2872_v57 = vpop.f32.mrb[51].mxu0  ;;  %v2981_v60 = vpop.f32.mrb[49].mxu1 }
 0x170   : > { %v1159_v58 = vadd.f32 %v2870_v53, %v4381_v48  ;;  %v2873_v59 = vadd.f32 %v2872_v57, %v2871_v54  ;;  %v2982_v61 = vadd.f32 %v2981_v60, %v2980_v55  ;;  %v2983_v63 = vpop.f32.mrb[50].mxu1 }
 0x171   : > { %v2984_v4 = vpop.f32.mrb[51].mxu1 }
 0x172   : > { %v1162_v0 = vadd.f32 %v2873_v59, %v4381_v48  ;;  %v4514_v6 = vadd.f32 %v2982_v61, %v1159_v58  ;;  %v2985_v7 = vadd.f32 %v2984_v4, %v2983_v63 }
 0x174   : > { %v2874_v9 = vpop.f32.mrb[52].mxu0  ;;  %v4516_v10 = vadd.f32 %v2985_v7, %v1162_v0 }
 0x175   : > { %v2875_v12 = vpop.f32.mrb[53].mxu0 }
 0x176   : > { %v2876_v13 = vadd.f32 %v2875_v12, %v2874_v9  ;;  %v2877_v15 = vpop.f32.mrb[54].mxu0  ;;  %v2986_v16 = vpop.f32.mrb[52].mxu1 }
 0x177   : > { %v2878_v17 = vpop.f32.mrb[55].mxu0  ;;  %v2987_v22 = vpop.f32.mrb[53].mxu1 }
 0x178   : > { %v1167_v18 = vadd.f32 %v2876_v13, %v4381_v48  ;;  %v2879_v19 = vadd.f32 %v2878_v17, %v2877_v15  ;;  %v2988_v23 = vadd.f32 %v2987_v22, %v2986_v16  ;;  %v2989_v26 = vpop.f32.mrb[54].mxu1 }
 0x179   : > { %v2990_v30 = vpop.f32.mrb[55].mxu1 }
 0x17a   : > { %v1170_v28 = vadd.f32 %v2879_v19, %v4381_v48  ;;  %v4520_v31 = vadd.f32 %v2988_v23, %v1167_v18  ;;  %v2991_v34 = vadd.f32 %v2990_v30, %v2989_v26 }
 0x17c   : > { %v2880_v35 = vpop.f32.mrb[56].mxu0  ;;  %v4522_v36 = vadd.f32 %v2991_v34, %v1170_v28 }
 0x17d   : > { %v2881_v37 = vpop.f32.mrb[57].mxu0 }
 0x17e   : > { %v2882_v38 = vadd.f32 %v2881_v37, %v2880_v35  ;;  %v2883_v39 = vpop.f32.mrb[58].mxu0  ;;  %v2992_v40 = vpop.f32.mrb[56].mxu1 }
 0x17f   : > { %v2884_v42 = vpop.f32.mrb[59].mxu0  ;;  %v2993_v52 = vpop.f32.mrb[57].mxu1 }
 0x180   : > { %v1175_v45 = vadd.f32 %v2882_v38, %v4381_v48  ;;  %v2885_v47 = vadd.f32 %v2884_v42, %v2883_v39  ;;  %v2994_v53 = vadd.f32 %v2993_v52, %v2992_v40  ;;  %v2995_v54 = vpop.f32.mrb[58].mxu1 }
 0x181   : > { %v2996_v57 = vpop.f32.mrb[59].mxu1 }
 0x182   : > { %v1178_v55 = vadd.f32 %v2885_v47, %v4381_v48  ;;  %v4526_v58 = vadd.f32 %v2994_v53, %v1175_v45  ;;  %v2997_v59 = vadd.f32 %v2996_v57, %v2995_v54 }
 0x184   : > { %v2886_v60 = vpop.f32.mrb[60].mxu0  ;;  %v4528_v61 = vadd.f32 %v2997_v59, %v1178_v55 }
 0x185   : > { %v2887_v63 = vpop.f32.mrb[61].mxu0 }
 0x186   : > { %v2888_v0 = vadd.f32 %v2887_v63, %v2886_v60  ;;  %v2889_v4 = vpop.f32.mrb[62].mxu0  ;;  %v2998_v7 = vpop.f32.mrb[60].mxu1 }
 0x187   : > { %v2890_v9 = vpop.f32.mrb[63].mxu0  ;;  %v2999_v15 = vpop.f32.mrb[61].mxu1 }
 0x188   : > { %v1183_v12 = vadd.f32 %v2888_v0, %v4381_v48  ;;  %v2891_v13 = vadd.f32 %v2890_v9, %v2889_v4  ;;  %v3000_v16 = vadd.f32 %v2999_v15, %v2998_v7  ;;  %v3001_v17 = vpop.f32.mrb[62].mxu1 }
 0x189   : > { %v3002_v19 = vpop.f32.mrb[63].mxu1 }
 0x18a   : > { %v1186_v18 = vadd.f32 %v2891_v13, %v4381_v48  ;;  %v4532_v22 = vadd.f32 %v3000_v16, %v1183_v12  ;;  %v3003_v23 = vadd.f32 %v3002_v19, %v3001_v17 }
 0x18c   : > { %v3020_v26 = vpop.f32.mrb[64].mxu0  ;;  %v4534_v28 = vadd.f32 %v3003_v23, %v1186_v18 }
 0x18d   : > { %v3021_v30 = vpop.f32.mrb[65].mxu0 }
 0x18e   : > { %v3022_v34 = vadd.f32 %v3021_v30, %v3020_v26  ;;  %v3023_v35 = vpop.f32.mrb[66].mxu0  ;;  %v3161_v38 = vpop.f32.mrb[64].mxu1 }
 0x18f   : > { %v3024_v37 = vpop.f32.mrb[67].mxu0  ;;  %v1545_v42 = vpop.f32.mrb[65].mxu1 }
 0x190   : > { %v3025_v39 = vadd.f32 %v3024_v37, %v3023_v35  ;;  %v1385_v40 = vadd.f32 %v3022_v34, %v4397_v3  ;;  %v3162_v45 = vpop.f32.mrb[66].mxu1 }
 0x191   : > { %v1548_v52 = vpop.f32.mrb[67].mxu1 }
 0x192   : > { %v1546_v47 = vadd.f32 %v1545_v42, %v1385_v40  ;;  %v1388_v48 = vadd.f32 %v3025_v39, %v4405_v8 }
 0x194   : > { %v1549_v53 = vadd.f32 %v1548_v52, %v1388_v48  ;;  %v3026_v54 = vpop.f32.mrb[68].mxu0  ;;  %v1672_v57 = vmax.f32 %v1546_v47, 0.0 }
 0x195   : > { %v3027_v55 = vpop.f32.mrb[69].mxu0 }
 0x196   : > { %v1673_v59 = vmax.f32 %v1549_v53, 0.0  ;;  %v3028_v60 = vadd.f32 %v3027_v55, %v3026_v54  ;;  %v3029_v63 = vpop.f32.mrb[70].mxu0  ;;  %v3165_v4 = vpop.f32.mrb[68].mxu1 }
 0x197   : > { %v3030_v0 = vpop.f32.mrb[71].mxu0  ;;  %v1561_v3 = vpop.f32.mrb[69].mxu1 }
 0x198   : > { %v1704_v7 = vpack.c.bf16 %v1673_v59, %v1672_v57  ;;  %v1393_v9 = vadd.f32 %v3028_v60, %v4421_v27  ;;  %v3031_v12 = vadd.f32 %v3030_v0, %v3029_v63  ;;  %v3166_v13 = vpop.f32.mrb[70].mxu1 }
 0x199   : > { %v1564_v8 = vpop.f32.mrb[71].mxu1 }
 0x19a   : > { %v1554_v15 = vadd.f32 %v3161_v38, %v1393_v9  ;;  %v1396_v16 = vadd.f32 %v3031_v12, %v4429_v32  ;;  %3207 = vmatprep.mubr.bf16.mxu1 %v1704_v7 }
 0x19c   : > { %v1557_v17 = vadd.f32 %v3162_v45, %v1396_v16  ;;  %v3032_v18 = vpop.f32.mrb[72].mxu0  ;;  %v1674_v23 = vmax.f32 %v1554_v15, 0.0 }
 0x19d   : > { %v3033_v19 = vpop.f32.mrb[73].mxu0 }
 0x19e   : > { %v1675_v26 = vmax.f32 %v1557_v17, 0.0  ;;  %v3034_v30 = vadd.f32 %v3033_v19, %v3032_v18  ;;  %v3035_v34 = vpop.f32.mrb[74].mxu0  ;;  %v3169_v37 = vpop.f32.mrb[72].mxu1 }
 0x19f   : > { %v3036_v35 = vpop.f32.mrb[75].mxu0  ;;  %v1577_v42 = vpop.f32.mrb[73].mxu1 }
 0x1a0   : > { %v1705_v39 = vpack.c.bf16 %v1675_v26, %v1674_v23  ;;  %v3037_v40 = vadd.f32 %v3036_v35, %v3035_v34  ;;  %v1401_v27 = vadd.f32 %v3034_v30, %v4442_v51  ;;  %v3170_v47 = vpop.f32.mrb[74].mxu1 }
 0x1a1   : > { %v1580_v48 = vpop.f32.mrb[75].mxu1 }
 0x1a2   : > { %v1562_v38 = vadd.f32 %v1561_v3, %v1401_v27  ;;  %3208 = vmatmul.mubr.bf16.vlgmr.msra.gmra.mrb[96].mxu1 %v1705_v39  ;;  %v1404_v32 = vadd.f32 %v3037_v40, %v4450_v56 }
 0x1a4   : > { %v1565_v45 = vadd.f32 %v1564_v8, %v1404_v32  ;;  %v3038_v52 = vpop.f32.mrb[76].mxu0  ;;  %v1676_v54 = vmax.f32 %v1562_v38, 0.0 }
 0x1a5   : > { %v3039_v53 = vpop.f32.mrb[77].mxu0 }
 0x1a6   : > { %v1677_v55 = vmax.f32 %v1565_v45, 0.0  ;;  %v3040_v57 = vadd.f32 %v3039_v53, %v3038_v52  ;;  %v3041_v59 = vpop.f32.mrb[78].mxu0  ;;  %v4542_v63 = vpop.f32.mrb[76].mxu1 }
 0x1a7   : > { %v3042_v60 = vpop.f32.mrb[79].mxu0  ;;  %v1593_v9 = vpop.f32.mrb[77].mxu1 }
 0x1a8   : > { %v1706_v0 = vpack.c.bf16 %v1677_v55, %v1676_v54  ;;  %v1409_v51 = vadd.f32 %v3040_v57, %v4460_v11  ;;  %v3043_v7 = vadd.f32 %v3042_v60, %v3041_v59  ;;  %v4545_v12 = vpop.f32.mrb[78].mxu1 }
 0x1a9   : > { %v1596_v15 = vpop.f32.mrb[79].mxu1 }
 0x1aa   : > { %v1570_v3 = vadd.f32 %v3165_v4, %v1409_v51  ;;  %v1412_v56 = vadd.f32 %v3043_v7, %v4462_v14  ;;  %3211 = vmatprep.mubr.bf16.mxu1 %v1706_v0 }
 0x1ac   : > { %v1573_v16 = vadd.f32 %v3166_v13, %v1412_v56  ;;  %v3044_v8 = vpop.f32.mrb[80].mxu0  ;;  %v1678_v18 = vmax.f32 %v1570_v3, 0.0 }
 0x1ad   : > { %v3045_v17 = vpop.f32.mrb[81].mxu0 }
 0x1ae   : > { %v1679_v19 = vmax.f32 %v1573_v16, 0.0  ;;  %v3046_v23 = vadd.f32 %v3045_v17, %v3044_v8  ;;  %v3047_v26 = vpop.f32.mrb[82].mxu0  ;;  %v4548_v34 = vpop.f32.mrb[80].mxu1 }
 0x1af   : > { %v3048_v30 = vpop.f32.mrb[83].mxu0  ;;  %v4551_v40 = vpop.f32.mrb[81].mxu1 }
 0x1b0   : > { %v3049_v11 = vadd.f32 %v3048_v30, %v3047_v26  ;;  %v1417_v35 = vadd.f32 %v3046_v23, %v4466_v29  ;;  %v1707_v39 = vpack.c.bf16 %v1679_v19, %v1678_v18  ;;  %v4553_v4 = vpop.f32.mrb[82].mxu1 }
 0x1b1   : > { %v4556_v27 = vpop.f32.mrb[83].mxu1 }
 0x1b2   : > { %v1578_v14 = vadd.f32 %v1577_v42, %v1417_v35  ;;  %3212 = vmatmul.mubr.bf16.gmra.mrb[100].mxu1 %v1707_v39  ;;  %v1420_v13 = vadd.f32 %v3049_v11, %v4468_v33 }
 0x1b4   : > { %v1581_v38 = vadd.f32 %v1580_v48, %v1420_v13  ;;  %v3050_v32 = vpop.f32.mrb[84].mxu0  ;;  %v1680_v52 = vmax.f32 %v1578_v14, 0.0 }
 0x1b5   : > { %v3051_v45 = vpop.f32.mrb[85].mxu0 }
 0x1b6   : > { %v1681_v53 = vmax.f32 %v1581_v38, 0.0  ;;  %v3052_v54 = vadd.f32 %v3051_v45, %v3050_v32  ;;  %v3053_v55 = vpop.f32.mrb[86].mxu0  ;;  %v4558_v29 = vpop.f32.mrb[84].mxu1 }
 0x1b7   : > { %v3054_v57 = vpop.f32.mrb[87].mxu0  ;;  %v4561_v42 = vpop.f32.mrb[85].mxu1 }
 0x1b8   : > { %v1708_v59 = vpack.c.bf16 %v1681_v53, %v1680_v52  ;;  %v1425_v60 = vadd.f32 %v3052_v54, %v4472_v46  ;;  %v3055_v0 = vadd.f32 %v3054_v57, %v3053_v55  ;;  %v4563_v51 = vpop.f32.mrb[86].mxu1 }
 0x1b9   : > { %v4566_v7 = vpop.f32.mrb[87].mxu1 }
 0x1ba   : > { %v1586_v33 = vadd.f32 %v3169_v37, %v1425_v60  ;;  %v1428_v48 = vadd.f32 %v3055_v0, %v4474_v50  ;;  %3215 = vmatprep.mubr.bf16.mxu1 %v1708_v59 }
 0x1bc   : > { %v1589_v3 = vadd.f32 %v3170_v47, %v1428_v48  ;;  %v3056_v56 = vpop.f32.mrb[88].mxu0  ;;  %v1682_v8 = vmax.f32 %v1586_v33, 0.0 }
 0x1bd   : > { %v3057_v16 = vpop.f32.mrb[89].mxu0 }
 0x1be   : > { %v1683_v17 = vmax.f32 %v1589_v3, 0.0  ;;  %v3058_v18 = vadd.f32 %v3057_v16, %v3056_v56  ;;  %v3059_v19 = vpop.f32.mrb[90].mxu0  ;;  %v4568_v46 = vpop.f32.mrb[88].mxu1 }
 0x1bf   : > { %v3060_v23 = vpop.f32.mrb[91].mxu0  ;;  %v4571_v37 = vpop.f32.mrb[89].mxu1 }
 0x1c0   : > { %v3061_v26 = vadd.f32 %v3060_v23, %v3059_v19  ;;  %v1433_v30 = vadd.f32 %v3058_v18, %v4478_v1  ;;  %v1709_v11 = vpack.c.bf16 %v1683_v17, %v1682_v8  ;;  %v4573_v50 = vpop.f32.mrb[90].mxu1 }
 0x1c1   : > { %v4576_v39 = vpop.f32.mrb[91].mxu1 }
 0x1c2   : > { %v1594_v35 = vadd.f32 %v1593_v9, %v1433_v30  ;;  %3216 = vmatmul.mubr.bf16.gmra.mrb[104].mxu1 %v1709_v11  ;;  %v1436_v47 = vadd.f32 %v3061_v26, %v4480_v5 }
 0x1c4   : > { %v1597_v14 = vadd.f32 %v1596_v15, %v1436_v47  ;;  %v3062_v13 = vpop.f32.mrb[92].mxu0  ;;  %v1684_v32 = vmax.f32 %v1594_v35, 0.0 }
 0x1c5   : > { %v3063_v38 = vpop.f32.mrb[93].mxu0 }
 0x1c6   : > { %v1685_v45 = vmax.f32 %v1597_v14, 0.0  ;;  %v3064_v52 = vadd.f32 %v3063_v38, %v3062_v13  ;;  %v3065_v53 = vpop.f32.mrb[94].mxu0  ;;  %v4578_v1 = vpop.f32.mrb[92].mxu1 }
 0x1c7   : > { %v3066_v54 = vpop.f32.mrb[95].mxu0  ;;  %v4581_v9 = vpop.f32.mrb[93].mxu1 }
 0x1c8   : > { %v1710_v55 = vpack.c.bf16 %v1685_v45, %v1684_v32  ;;  %v1441_v57 = vadd.f32 %v3064_v52, %v4484_v21  ;;  %v3067_v59 = vadd.f32 %v3066_v54, %v3065_v53  ;;  %v4583_v60 = vpop.f32.mrb[94].mxu1 }
 0x1c9   : > { %v4587_v0 = vpop.f32.mrb[95].mxu1 }
 0x1ca   : > { %v1602_v5 = vadd.f32 %v4542_v63, %v1441_v57  ;;  %v1444_v15 = vadd.f32 %v3067_v59, %v4486_v24  ;;  %3219 = vmatprep.mubr.bf16.mxu1 %v1710_v55 }
 0x1cc   : > { %v1605_v33 = vadd.f32 %v4545_v12, %v1444_v15  ;;  %v3068_v48 = vpop.f32.mrb[96].mxu0  ;;  %v1686_v56 = vmax.f32 %v1602_v5, 0.0 }
 0x1cd   : > { %v3069_v3 = vpop.f32.mrb[97].mxu0 }
 0x1ce   : > { %v1687_v16 = vmax.f32 %v1605_v33, 0.0  ;;  %v3070_v8 = vadd.f32 %v3069_v3, %v3068_v48  ;;  %v3071_v21 = vpop.f32.mrb[98].mxu0 }
 0x1cf   : > { %v3072_v17 = vpop.f32.mrb[99].mxu0 }
 0x1d0   : > { %v3073_v18 = vadd.f32 %v3072_v17, %v3071_v21  ;;  %v1449_v19 = vadd.f32 %v3070_v8, %v4490_v41  ;;  %v1711_v23 = vpack.c.bf16 %v1687_v16, %v1686_v56 }
 0x1d2   : > { %v1610_v63 = vadd.f32 %v4551_v40, %v1449_v19  ;;  %3220 = vmatmul.mubr.bf16.gmra.mrb[108].mxu1 %v1711_v23  ;;  %v1452_v24 = vadd.f32 %v3073_v18, %v4492_v44 }
 0x1d4   : > { %v1613_v26 = vadd.f32 %v4556_v27, %v1452_v24  ;;  %v3074_v30 = vpop.f32.mrb[100].mxu0  ;;  %v1688_v11 = vmax.f32 %v1610_v63, 0.0 }
 0x1d5   : > { %v3075_v12 = vpop.f32.mrb[101].mxu0 }
 0x1d6   : > { %v1689_v35 = vmax.f32 %v1613_v26, 0.0  ;;  %v3076_v47 = vadd.f32 %v3075_v12, %v3074_v30  ;;  %v3077_v14 = vpop.f32.mrb[102].mxu0 }
 0x1d7   : > { %v3078_v13 = vpop.f32.mrb[103].mxu0 }
 0x1d8   : > { %v1712_v38 = vpack.c.bf16 %v1689_v35, %v1688_v11  ;;  %v1457_v32 = vadd.f32 %v3076_v47, %v4496_v62  ;;  %v3079_v45 = vadd.f32 %v3078_v13, %v3077_v14 }
 0x1da   : > { %v1618_v41 = vadd.f32 %v4548_v34, %v1457_v32  ;;  %v1460_v40 = vadd.f32 %v3079_v45, %v4498_v2  ;;  %3223 = vmatprep.mubr.bf16.mxu1 %v1712_v38 }
 0x1dc   : > { %v1621_v44 = vadd.f32 %v4553_v4, %v1460_v40  ;;  %v3080_v52 = vpop.f32.mrb[104].mxu0  ;;  %v1690_v53 = vmax.f32 %v1618_v41, 0.0 }
 0x1dd   : > { %v3081_v27 = vpop.f32.mrb[105].mxu0 }
 0x1de   : > { %v1691_v54 = vmax.f32 %v1621_v44, 0.0  ;;  %v3082_v55 = vadd.f32 %v3081_v27, %v3080_v52  ;;  %v3083_v57 = vpop.f32.mrb[106].mxu0 }
 0x1df   : > { %v3084_v59 = vpop.f32.mrb[107].mxu0 }
 0x1e0   : > { %v3085_v5 = vadd.f32 %v3084_v59, %v3083_v57  ;;  %v1465_v15 = vadd.f32 %v3082_v55, %v4502_v20  ;;  %v1713_v33 = vpack.c.bf16 %v1691_v54, %v1690_v53 }
 0x1e2   : > { %v1626_v62 = vadd.f32 %v4561_v42, %v1465_v15  ;;  %3224 = vmatmul.mubr.bf16.gmra.mrb[112].mxu1 %v1713_v33  ;;  %v1468_v34 = vadd.f32 %v3085_v5, %v4504_v25 }
 0x1e4   : > { %v1629_v2 = vadd.f32 %v4566_v7, %v1468_v34  ;;  %v3086_v48 = vpop.f32.mrb[108].mxu0  ;;  %v1692_v3 = vmax.f32 %v1626_v62, 0.0 }
 0x1e5   : > { %v3087_v4 = vpop.f32.mrb[109].mxu0 }
 0x1e6   : > { %v1693_v56 = vmax.f32 %v1629_v2, 0.0  ;;  %v3088_v16 = vadd.f32 %v3087_v4, %v3086_v48  ;;  %v3089_v8 = vpop.f32.mrb[110].mxu0 }
 0x1e7   : > { %v3090_v21 = vpop.f32.mrb[111].mxu0 }
 0x1e8   : > { %v1714_v17 = vpack.c.bf16 %v1693_v56, %v1692_v3  ;;  %v1473_v18 = vadd.f32 %v3088_v16, %v4508_v43  ;;  %v3091_v19 = vadd.f32 %v3090_v21, %v3089_v8 }
 0x1ea   : > { %v1634_v20 = vadd.f32 %v4558_v29, %v1473_v18  ;;  %v1476_v42 = vadd.f32 %v3091_v19, %v4510_v49  ;;  %3227 = vmatprep.mubr.bf16.mxu1 %v1714_v17 }
 0x1ec   : > { %v1637_v25 = vadd.f32 %v4563_v51, %v1476_v42  ;;  %v3092_v23 = vpop.f32.mrb[112].mxu0  ;;  %v1694_v63 = vmax.f32 %v1634_v20, 0.0 }
 0x1ed   : > { %v3093_v7 = vpop.f32.mrb[113].mxu0 }
 0x1ee   : > { %v1695_v24 = vmax.f32 %v1637_v25, 0.0  ;;  %v3094_v26 = vadd.f32 %v3093_v7, %v3092_v23  ;;  %v3095_v30 = vpop.f32.mrb[114].mxu0 }
 0x1ef   : > { %v3096_v12 = vpop.f32.mrb[115].mxu0 }
 0x1f0   : > { %v3097_v11 = vadd.f32 %v3096_v12, %v3095_v30  ;;  %v1481_v35 = vadd.f32 %v3094_v26, %v4514_v6  ;;  %v1715_v47 = vpack.c.bf16 %v1695_v24, %v1694_v63 }
 0x1f2   : > { %v1642_v43 = vadd.f32 %v4571_v37, %v1481_v35  ;;  %3228 = vmatmul.mubr.bf16.gmra.mrb[116].mxu1 %v1715_v47  ;;  %v1484_v29 = vadd.f32 %v3097_v11, %v4516_v10 }
 0x1f4   : > { %v1645_v49 = vadd.f32 %v4576_v39, %v1484_v29  ;;  %v3098_v14 = vpop.f32.mrb[116].mxu0  ;;  %v1696_v13 = vmax.f32 %v1642_v43, 0.0 }
 0x1f5   : > { %v3099_v51 = vpop.f32.mrb[117].mxu0 }
 0x1f6   : > { %v1697_v38 = vmax.f32 %v1645_v49, 0.0  ;;  %v3100_v32 = vadd.f32 %v3099_v51, %v3098_v14  ;;  %v3101_v45 = vpop.f32.mrb[118].mxu0 }
 0x1f7   : > { %v3102_v41 = vpop.f32.mrb[119].mxu0 }
 0x1f8   : > { %v1716_v40 = vpack.c.bf16 %v1697_v38, %v1696_v13  ;;  %v1489_v44 = vadd.f32 %v3100_v32, %v4520_v31  ;;  %v3103_v52 = vadd.f32 %v3102_v41, %v3101_v45 }
 0x1fa   : > { %v1650_v6 = vadd.f32 %v4568_v46, %v1489_v44  ;;  %v1492_v37 = vadd.f32 %v3103_v52, %v4522_v36  ;;  %3231 = vmatprep.mubr.bf16.mxu1 %v1716_v40 }
 0x1fc   : > { %v1653_v10 = vadd.f32 %v4573_v50, %v1492_v37  ;;  %v3104_v27 = vpop.f32.mrb[120].mxu0  ;;  %v1698_v53 = vmax.f32 %v1650_v6, 0.0 }
 0x1fd   : > { %v3105_v39 = vpop.f32.mrb[121].mxu0 }
 0x1fe   : > { %v1699_v54 = vmax.f32 %v1653_v10, 0.0  ;;  %v3106_v55 = vadd.f32 %v3105_v39, %v3104_v27  ;;  %v3107_v57 = vpop.f32.mrb[122].mxu0 }
 0x1ff   : > { %v3108_v59 = vpop.f32.mrb[123].mxu0 }
 0x200   : > { %v3109_v5 = vadd.f32 %v3108_v59, %v3107_v57  ;;  %v1497_v15 = vadd.f32 %v3106_v55, %v4526_v58  ;;  %v1717_v33 = vpack.c.bf16 %v1699_v54, %v1698_v53 }
 0x202   : > { %v1658_v31 = vadd.f32 %v4581_v9, %v1497_v15  ;;  %3232 = vmatmul.mubr.bf16.gmra.mrb[120].mxu1 %v1717_v33  ;;  %v1500_v46 = vadd.f32 %v3109_v5, %v4528_v61 }
 0x204   : > { %v1661_v36 = vadd.f32 %v4587_v0, %v1500_v46  ;;  %v3110_v62 = vpop.f32.mrb[124].mxu0  ;;  %v1700_v34 = vmax.f32 %v1658_v31, 0.0 }
 0x205   : > { %v3111_v50 = vpop.f32.mrb[125].mxu0 }
 0x206   : > { %v1701_v2 = vmax.f32 %v1661_v36, 0.0  ;;  %v3112_v48 = vadd.f32 %v3111_v50, %v3110_v62  ;;  %v3113_v4 = vpop.f32.mrb[126].mxu0 }
 0x207   : > { %v3114_v3 = vpop.f32.mrb[127].mxu0 }
 0x208   : > { %v1718_v56 = vpack.c.bf16 %v1701_v2, %v1700_v34  ;;  %v1505_v16 = vadd.f32 %v3112_v48, %v4532_v22  ;;  %v3115_v8 = vadd.f32 %v3114_v3, %v3113_v4  ;;  %v1978_v48 = vlaneseq }
 0x20a   : > { %v1666_v58 = vadd.f32 %v4578_v1, %v1505_v16  ;;  %v1508_v9 = vadd.f32 %v3115_v8, %v4534_v28  ;;  %3235 = vmatprep.mubr.bf16.mxu1 %v1718_v56  ;;  %v1979_v4 = vshrl.u32 %v1978_v48, 7 }
 0x20c   : > { %v1669_v61 = vadd.f32 %v4583_v60, %v1508_v9  ;;  %v1702_v21 = vmax.f32 %v1666_v58, 0.0  ;;  %v4734_v3 = vadd.s32 248, %v1979_v4 }
 0x20e   : > { %v1703_v0 = vmax.f32 %v1669_v61, 0.0  ;;  %vm2075_vm1 = vcmp.lt.s32.totalorder %v4734_v3, 250 }
 0x210   : > { %v1719_v17 = vpack.c.bf16 %v1703_v0, %v1702_v21 }
 0x212   : > { %3236 = vmatmul.mubr.bf16.gmra.mrb[124].mxu1 %v1719_v17 }
 0x275   : > { %v4622_v18 = vpop.f32.mrb[96].mxu1 }
 0x276   : > { %1948 = vst [vmem:[#allocation2 + $0x10] sm:$0xff] %v4622_v18  ;;  %v4625_v19 = vpop.f32.mrb[97].mxu1 }
 0x277   : > { %1946 = vst [vmem:[#allocation2] sm:$0xff] %v4625_v19  ;;  %v4628_v22 = vpop.f32.mrb[98].mxu1 }
 0x278   : > { %1949 = vst [vmem:[#allocation2 + $0x18] sm:$0xff] %v4628_v22  ;;  %v4631_v28 = vpop.f32.mrb[99].mxu1 }
 0x279   : > { %1947 = vst [vmem:[#allocation2 + $0x8] sm:$0xff] %v4631_v28 }
 0x285   : > { %v4634_v1 = vpop.f32.mrb[100].mxu1 }
 0x286   : > { %1952 = vst [vmem:[#allocation2 + $0x30] sm:$0xff] %v4634_v1  ;;  %v2174_v60 = vmax.f32 %v4622_v18, %v4634_v1  ;;  %v4639_v20 = vpop.f32.mrb[101].mxu1 }
 0x287   : > { %1950 = vst [vmem:[#allocation2 + $0x20] sm:$0xff] %v4639_v20  ;;  %v2172_v42 = vmax.f32 %v4625_v19, %v4639_v20  ;;  %v4644_v25 = vpop.f32.mrb[102].mxu1 }
 0x288   : > { %1953 = vst [vmem:[#allocation2 + $0x38] sm:$0xff] %v4644_v25  ;;  %v2175_v23 = vmax.f32 %v4628_v22, %v4644_v25  ;;  %v4649_v7 = vpop.f32.mrb[103].mxu1 }
 0x289   : > { %1951 = vst [vmem:[#allocation2 + $0x28] sm:$0xff] %v4649_v7  ;;  %v2173_v63 = vmax.f32 %v4631_v28, %v4649_v7 }
 0x295   : > { %v4654_v24 = vpop.f32.mrb[104].mxu1 }
 0x296   : > { %1956 = vst [vmem:[#allocation2 + $0x50] sm:$0xff] %v4654_v24  ;;  %v2178_v26 = vmax.f32 %v2174_v60, %v4654_v24  ;;  %v4658_v30 = vpop.f32.mrb[105].mxu1 }
 0x297   : > { %1954 = vst [vmem:[#allocation2 + $0x40] sm:$0xff] %v4658_v30  ;;  %v2176_v12 = vmax.f32 %v2172_v42, %v4658_v30  ;;  %v4662_v11 = vpop.f32.mrb[106].mxu1 }
 0x298   : > { %1957 = vst [vmem:[#allocation2 + $0x58] sm:$0xff] %v4662_v11  ;;  %v2179_v35 = vmax.f32 %v2175_v23, %v4662_v11  ;;  %v4666_v47 = vpop.f32.mrb[107].mxu1 }
 0x299   : > { %1955 = vst [vmem:[#allocation2 + $0x48] sm:$0xff] %v4666_v47  ;;  %v2177_v43 = vmax.f32 %v2173_v63, %v4666_v47 }
 0x2a5   : > { %v4670_v29 = vpop.f32.mrb[108].mxu1 }
 0x2a6   : > { %1960 = vst [vmem:[#allocation2 + $0x70] sm:$0xff] %v4670_v29  ;;  %v2182_v49 = vmax.f32 %v2178_v26, %v4670_v29  ;;  %v4674_v14 = vpop.f32.mrb[109].mxu1 }
 0x2a7   : > { %1958 = vst [vmem:[#allocation2 + $0x60] sm:$0xff] %v4674_v14  ;;  %v2180_v51 = vmax.f32 %v2176_v12, %v4674_v14  ;;  %v4678_v13 = vpop.f32.mrb[110].mxu1 }
 0x2a8   : > { %1961 = vst [vmem:[#allocation2 + $0x78] sm:$0xff] %v4678_v13  ;;  %v2183_v38 = vmax.f32 %v2179_v35, %v4678_v13  ;;  %v4682_v32 = vpop.f32.mrb[111].mxu1 }
 0x2a9   : > { %1959 = vst [vmem:[#allocation2 + $0x68] sm:$0xff] %v4682_v32  ;;  %v2181_v45 = vmax.f32 %v2177_v43, %v4682_v32 }
 0x2b5   : > { %v4686_v41 = vpop.f32.mrb[112].mxu1 }
 0x2b6   : > { %1964 = vst [vmem:[#allocation2 + $0x90] sm:$0xff] %v4686_v41  ;;  %v2186_v40 = vmax.f32 %v2182_v49, %v4686_v41  ;;  %v4690_v44 = vpop.f32.mrb[113].mxu1  ;;  %v4755_v49 = vld [vmem:[#allocation3] sm:$0x1] }
 0x2b7   : > { %1962 = vst [vmem:[#allocation2 + $0x80] sm:$0xff] %v4690_v44  ;;  %v2184_v52 = vmax.f32 %v2180_v51, %v4690_v44  ;;  %v4694_v6 = vpop.f32.mrb[114].mxu1  ;;  %v2217_v51 = vsub.s32 0, %v1979_v4 }
 0x2b8   : > { %1965 = vst [vmem:[#allocation2 + $0x98] sm:$0xff] %v4694_v6  ;;  %v2187_v37 = vmax.f32 %v2183_v38, %v4694_v6  ;;  %v4698_v10 = vpop.f32.mrb[115].mxu1 }
 0x2b9   : > { %1963 = vst [vmem:[#allocation2 + $0x88] sm:$0xff] %v4698_v10  ;;  %v2185_v27 = vmax.f32 %v2181_v45, %v4698_v10 }
 0x2c5   : > { %v4702_v39 = vpop.f32.mrb[116].mxu1 }
 0x2c6   : > { %1968 = vst [vmem:[#allocation2 + $0xb0] sm:$0xff] %v4702_v39  ;;  %v2190_v53 = vmax.f32 %v2186_v40, %v4702_v39  ;;  %v4706_v54 = vpop.f32.mrb[117].mxu1 }
 0x2c7   : > { %1966 = vst [vmem:[#allocation2 + $0xa0] sm:$0xff] %v4706_v54  ;;  %v2188_v55 = vmax.f32 %v2184_v52, %v4706_v54  ;;  %v4710_v57 = vpop.f32.mrb[118].mxu1 }
 0x2c8   : > { %1969 = vst [vmem:[#allocation2 + $0xb8] sm:$0xff] %v4710_v57  ;;  %v2191_v59 = vmax.f32 %v2187_v37, %v4710_v57  ;;  %v4714_v5 = vpop.f32.mrb[119].mxu1 }
 0x2c9   : > { %1967 = vst [vmem:[#allocation2 + $0xa8] sm:$0xff] %v4714_v5  ;;  %v2189_v15 = vmax.f32 %v2185_v27, %v4714_v5 }
 0x2d5   : > { %v4718_v33 = vpop.f32.mrb[120].mxu1 }
 0x2d6   : > { %1972 = vst [vmem:[#allocation2 + $0xd0] sm:$0xff] %v4718_v33  ;;  %v2194_v31 = vmax.f32 %v2190_v53, %v4718_v33  ;;  %v4722_v46 = vpop.f32.mrb[121].mxu1 }
 0x2d7   : > { %1970 = vst [vmem:[#allocation2 + $0xc0] sm:$0xff] %v4722_v46  ;;  %v2192_v36 = vmax.f32 %v2188_v55, %v4722_v46  ;;  %v4726_v62 = vpop.f32.mrb[122].mxu1 }
 0x2d8   : > { %1973 = vst [vmem:[#allocation2 + $0xd8] sm:$0xff] %v4726_v62  ;;  %v2195_v50 = vmax.f32 %v2191_v59, %v4726_v62  ;;  %v4730_v34 = vpop.f32.mrb[123].mxu1 }
 0x2d9   : > { %1971 = vst [vmem:[#allocation2 + $0xc8] sm:$0xff] %v4730_v34  ;;  %v2193_v2 = vmax.f32 %v2189_v15, %v4730_v34 }
 0x2e5   : > { %v4736_v56 = vpop.f32.mrb[124].mxu1 }
 0x2e6   : > { %1976 = vst [vmem:[#allocation2 + $0xf0] sm:$0xff] %v4736_v56  ;;  %v2198_v16 = vmax.f32 %v2194_v31, %v4736_v56  ;;  %v4741_v8 = vpop.f32.mrb[125].mxu1 }
 0x2e7   : > { %1974 = vst [vmem:[#allocation2 + $0xe0] sm:$0xff] %v4741_v8  ;;  %v2196_v58 = vmax.f32 %v2192_v36, %v4741_v8  ;;  %v4745_v9 = vpop.f32.mrb[126].mxu1 }
 0x2e8   : > { %1977 = vst [vmem:[#allocation2 + $0xf8] sm:$0xff] %v4745_v9  ;;  %v2171_v61 = vsel %vm2075_vm1, %v4745_v9, -inf  ;;  %v4751_v21 = vpop.f32.mrb[127].mxu1 }
 0x2e9   : > { %v2199_v0 = vmax.f32 %v2195_v50, %v2171_v61  ;;  %1975 = vst [vmem:[#allocation2 + $0xe8] sm:$0xff] %v4751_v21  ;;  %v2197_v17 = vmax.f32 %v2193_v2, %v4751_v21 }
 0x2eb   : > { %v2201_v60 = vmax.f32 %v2198_v16, %v2199_v0  ;;  %v2200_v42 = vmax.f32 %v2196_v58, %v2197_v17 }
 0x2ed   : > { %v2202_v23 = vmax.f32 %v2200_v42, %v2201_v60 }
 0x2ef   : > { %v2203_v63 = vrot.slane %v2202_v23, 4 }
 0x2f1   : > { %v2204_v26 = vmax.f32 %v2202_v23, %v2203_v63 }
 0x2f3   : > { %v2205_v12 = vrot.slane %v2204_v26, 2 }
 0x2f5   : > { %v2206_v35 = vmax.f32 %v2204_v26, %v2205_v12 }
 0x2f7   : > { %v2207_v43 = vrot.slane %v2206_v35, 1 }
 0x2f9   : > { %v2208_v38 = vmax.f32 %v2206_v35, %v2207_v43 }
 0x2fb   : > { %v4758_v45 = vmax.f32 %v4755_v49, %v2208_v38 }
 0x2fd   : > { %v4763_v52 = vrot.slane %v4758_v45, %v2217_v51  ;;  %2389 = vst [vmem:[#allocation3] sm:$0x1] %v4758_v45 }
 0x2ff   : > { %v2220_v37 = vsub.f32 %v4625_v19, %v4763_v52  ;;  %v2221_v27 = vsub.f32 %v4631_v28, %v4763_v52  ;;  %v2222_v53 = vsub.f32 %v4622_v18, %v4763_v52  ;;  %v2223_v55 = vsub.f32 %v4628_v22, %v4763_v52 }
 0x300   : > { %v2224_v59 = vsub.f32 %v4639_v20, %v4763_v52  ;;  %v2225_v15 = vsub.f32 %v4649_v7, %v4763_v52  ;;  %v2226_v31 = vsub.f32 %v4634_v1, %v4763_v52  ;;  %v2227_v19 = vsub.f32 %v4644_v25, %v4763_v52 }
 0x301   : > { %v2228_v28 = vsub.f32 %v4658_v30, %v4763_v52  ;;  %v2229_v18 = vsub.f32 %v4666_v47, %v4763_v52  ;;  %v2230_v22 = vsub.f32 %v4654_v24, %v4763_v52  ;;  %v2231_v20 = vsub.f32 %v4662_v11, %v4763_v52 }
 0x302   : > { %v2232_v7 = vsub.f32 %v4674_v14, %v4763_v52  ;;  %v2233_v1 = vsub.f32 %v4682_v32, %v4763_v52  ;;  %v2234_v25 = vsub.f32 %v4670_v29, %v4763_v52  ;;  %v2235_v30 = vsub.f32 %v4678_v13, %v4763_v52 }
 0x303   : > { %v2236_v47 = vsub.f32 %v4690_v44, %v4763_v52  ;;  %v2237_v24 = vsub.f32 %v4698_v10, %v4763_v52  ;;  %v2238_v11 = vsub.f32 %v4686_v41, %v4763_v52  ;;  %v2239_v14 = vsub.f32 %v4694_v6, %v4763_v52 }
 0x304   : > { %v2240_v32 = vsub.f32 %v4706_v54, %v4763_v52  ;;  %v2241_v29 = vsub.f32 %v4714_v5, %v4763_v52  ;;  %v2242_v13 = vsub.f32 %v4702_v39, %v4763_v52  ;;  %v2243_v36 = vsub.f32 %v4710_v57, %v4763_v52 }
 0x305   : > { %v2244_v50 = vsub.f32 %v4722_v46, %v4763_v52  ;;  %v2245_v2 = vsub.f32 %v4730_v34, %v4763_v52  ;;  %v2246_v48 = vsub.f32 %v4718_v33, %v4763_v52  ;;  %v2247_v4 = vsub.f32 %v4726_v62, %v4763_v52 }
 0x306   : > { %v2248_v16 = vsub.f32 %v4741_v8, %v4763_v52  ;;  %v2249_v58 = vsub.f32 %v4751_v21, %v4763_v52  ;;  %v2251_v0 = vsub.f32 %v4745_v9, %v4763_v52  ;;  %v2252_v17 = vmul.f32 1.442695, %v2220_v37 }
 0x307   : > { %v2254_v60 = vmul.f32 1.442695, %v2221_v27  ;;  %v2256_v42 = vmul.f32 1.442695, %v2222_v53  ;;  %v2258_v23 = vmul.f32 1.442695, %v2223_v55 }
 0x308   : > { %3336 = vpow2.f32 %v2252_v17  ;;  %v2260_v63 = vmul.f32 1.442695, %v2224_v59  ;;  %v2262_v26 = vmul.f32 1.442695, %v2225_v15  ;;  %v2264_v12 = vmul.f32 1.442695, %v2226_v31 }
 0x309   : > { %3338 = vpow2.f32 %v2254_v60  ;;  %v2266_v35 = vmul.f32 1.442695, %v2227_v19  ;;  %v2268_v38 = vmul.f32 1.442695, %v2228_v28  ;;  %v2270_v37 = vmul.f32 1.442695, %v2229_v18 }
 0x30a   : > { %3340 = vpow2.f32 %v2256_v42  ;;  %v2272_v55 = vmul.f32 1.442695, %v2230_v22  ;;  %v2274_v15 = vmul.f32 1.442695, %v2231_v20  ;;  %v2276_v19 = vmul.f32 1.442695, %v2232_v7 }
 0x30b   : > { %3342 = vpow2.f32 %v2258_v23  ;;  %v2278_v28 = vmul.f32 1.442695, %v2233_v1  ;;  %v2280_v18 = vmul.f32 1.442695, %v2234_v25  ;;  %v2282_v22 = vmul.f32 1.442695, %v2235_v30 }
 0x30c   : > { %3344 = vpow2.f32 %v2260_v63  ;;  %v2284_v20 = vmul.f32 1.442695, %v2236_v47  ;;  %v2286_v1 = vmul.f32 1.442695, %v2237_v24  ;;  %v2288_v30 = vmul.f32 1.442695, %v2238_v11 }
 0x30d   : > { %3346 = vpow2.f32 %v2262_v26  ;;  %v2290_v44 = vmul.f32 1.442695, %v2239_v14  ;;  %v2292_v10 = vmul.f32 1.442695, %v2240_v32  ;;  %v2294_v41 = vmul.f32 1.442695, %v2241_v29 }
 0x30e   : > { %3348 = vpow2.f32 %v2264_v12  ;;  %v2296_v6 = vmul.f32 1.442695, %v2242_v13  ;;  %v2298_v54 = vmul.f32 1.442695, %v2243_v36  ;;  %v2300_v5 = vmul.f32 1.442695, %v2244_v50 }
 0x30f   : > { %3350 = vpow2.f32 %v2266_v35  ;;  %v2302_v39 = vmul.f32 1.442695, %v2245_v2  ;;  %v2304_v57 = vmul.f32 1.442695, %v2246_v48  ;;  %v2306_v46 = vmul.f32 1.442695, %v2247_v4 }
 0x310   : > { %3352 = vpow2.f32 %v2268_v38  ;;  %v2308_v34 = vmul.f32 1.442695, %v2248_v16  ;;  %v2310_v33 = vmul.f32 1.442695, %v2249_v58  ;;  %v2314_v48 = vmul.f32 1.442695, %v2251_v0 }
 0x311   : > { %3354 = vpow2.f32 %v2270_v37 }
 0x312   : > { %v3337_v43 = vpop.eup %3336  ;;  %3356 = vpow2.f32 %v2272_v55 }
 0x313   : > { %v3339_v51 = vpop.eup %3338  ;;  %3358 = vpow2.f32 %v2274_v15 }
 0x314   : > { %v2350_v40 = vadd.f32 %v3339_v51, %v3337_v43  ;;  %v3341_v61 = vpop.eup %3340  ;;  %3360 = vpow2.f32 %v2276_v19 }
 0x315   : > { %v3343_v53 = vpop.eup %3342  ;;  %3362 = vpow2.f32 %v2278_v28 }
 0x316   : > { %v2351_v27 = vadd.f32 %v3341_v61, %v2350_v40  ;;  %v3345_v59 = vpop.eup %3344  ;;  %3364 = vpow2.f32 %v2280_v18 }
 0x317   : > { %v3347_v31 = vpop.eup %3346  ;;  %3366 = vpow2.f32 %v2282_v22 }
 0x318   : > { %v2352_v17 = vadd.f32 %v3343_v53, %v2351_v27  ;;  %v3349_v23 = vpop.eup %3348  ;;  %3368 = vpow2.f32 %v2284_v20 }
 0x319   : > { %v3351_v26 = vpop.eup %3350  ;;  %3370 = vpow2.f32 %v2286_v1 }
 0x31a   : > { %v2353_v60 = vadd.f32 %v3345_v59, %v2352_v17  ;;  %v3353_v61 = vpop.eup %3352  ;;  %3372 = vpow2.f32 %v2288_v30 }
 0x31b   : > { %v3355_v35 = vpop.eup %3354  ;;  %3374 = vpow2.f32 %v2290_v44  ;;  %v2348_v44 = vld [vmem:[#allocation4] sm:$0x1] }
 0x31c   : > { %v2354_v42 = vadd.f32 %v3347_v31, %v2353_v60  ;;  %v3357_v43 = vpop.eup %3356  ;;  %3376 = vpow2.f32 %v2292_v10 }
 0x31d   : > { %v3359_v25 = vpop.eup %3358  ;;  %3378 = vpow2.f32 %v2294_v41 }
 0x31e   : > { %v2355_v63 = vadd.f32 %v3349_v23, %v2354_v42  ;;  %v3361_v37 = vpop.eup %3360  ;;  %3380 = vpow2.f32 %v2296_v6  ;;  %v4993_v23 = vsub.f32 %v4736_v56, %v4763_v52 }
 0x31f   : > { %v3363_v27 = vpop.eup %3362  ;;  %3382 = vpow2.f32 %v2298_v54 }
 0x320   : > { %v2356_v40 = vadd.f32 %v3351_v26, %v2355_v63  ;;  %v3365_v53 = vpop.eup %3364  ;;  %3384 = vpow2.f32 %v2300_v5  ;;  %v2312_v28 = vmul.f32 1.442695, %v4993_v23 }
 0x321   : > { %v3367_v55 = vpop.eup %3366  ;;  %3386 = vpow2.f32 %v2302_v39 }
 0x322   : > { %v2357_v12 = vadd.f32 %v3353_v61, %v2356_v40  ;;  %v3369_v17 = vpop.eup %3368  ;;  %3388 = vpow2.f32 %v2304_v57 }
 0x323   : > { %v3371_v59 = vpop.eup %3370  ;;  %3390 = vpow2.f32 %v2306_v46 }
 0x324   : > { %v2358_v7 = vadd.f32 %v3355_v35, %v2357_v12  ;;  %v3373_v15 = vpop.eup %3372  ;;  %3392 = vpow2.f32 %v2308_v34  ;;  %v4994_v12 = vsub.f32 %v4755_v49, %v4758_v45 }
 0x325   : > { %v3375_v60 = vpop.eup %3374  ;;  %3394 = vpow2.f32 %v2310_v33 }
 0x326   : > { %v2359_v51 = vadd.f32 %v3357_v43, %v2358_v7  ;;  %v3377_v31 = vpop.eup %3376  ;;  %3396 = vpow2.f32 %v2314_v48  ;;  %v2212_v56 = vmul.f32 1.442695, %v4994_v12 }
 0x327   : > { %v3379_v19 = vpop.eup %3378  ;;  %3398 = vpow2.f32 %v2312_v28 }
 0x328   : > { %v2360_v38 = vadd.f32 %v3359_v25, %v2359_v51  ;;  %v3381_v42 = vpop.eup %3380  ;;  %3400 = vpow2.f32 %v2212_v56 }
 0x329   : > { %v3383_v4 = vpop.eup %3382 }
 0x32a   : > { %v2361_v47 = vadd.f32 %v3361_v37, %v2360_v38  ;;  %v3385_v16 = vpop.eup %3384 }
 0x32b   : > { %v3387_v26 = vpop.eup %3386 }
 0x32c   : > { %v2362_v24 = vadd.f32 %v3363_v27, %v2361_v47  ;;  %v3389_v58 = vpop.eup %3388 }
 0x32d   : > { %v3391_v40 = vpop.eup %3390 }
 0x32e   : > { %v2363_v11 = vadd.f32 %v3365_v53, %v2362_v24  ;;  %v3393_v0 = vpop.eup %3392 }
 0x32f   : > { %v3395_v22 = vpop.eup %3394 }
 0x330   : > { %v2364_v14 = vadd.f32 %v3367_v55, %v2363_v11  ;;  %v3397_v52 = vpop.eup %3396 }
 0x331   : > { %v3399_v20 = vpop.eup %3398  ;;  %v2347_v43 = vsel %vm2075_vm1, %v3397_v52, 0.0 }
 0x332   : > { %v2365_v32 = vadd.f32 %v3369_v17, %v2364_v14  ;;  %v3401_v37 = vpop.eup %3400 }
 0x333   : > { %v2349_v27 = vmul.f32 %v3401_v37, %v2348_v44 }
 0x334   : > { %v2366_v29 = vadd.f32 %v3371_v59, %v2365_v32 }
 0x336   : > { %v2367_v13 = vadd.f32 %v3373_v15, %v2366_v29 }
 0x338   : > { %v2368_v36 = vadd.f32 %v3375_v60, %v2367_v13 }
 0x33a   : > { %v2369_v50 = vadd.f32 %v3377_v31, %v2368_v36 }
 0x33c   : > { %v2370_v2 = vadd.f32 %v3379_v19, %v2369_v50 }
 0x33e   : > { %v2371_v62 = vadd.f32 %v3381_v42, %v2370_v2 }
 0x340   : > { %v2372_v8 = vadd.f32 %v3383_v4, %v2371_v62 }
 0x342   : > { %v2373_v63 = vadd.f32 %v3385_v16, %v2372_v8 }
 0x344   : > { %v2374_v21 = vadd.f32 %v3387_v26, %v2373_v63 }
 0x346   : > { %v2375_v18 = vadd.f32 %v3389_v58, %v2374_v21 }
 0x348   : > { %v2376_v9 = vadd.f32 %v3391_v40, %v2375_v18 }
 0x34a   : > { %v2377_v61 = vadd.f32 %v3393_v0, %v2376_v9 }
 0x34c   : > { %v2378_v35 = vadd.f32 %v3395_v22, %v2377_v61 }
 0x34e   : > { %v2379_v7 = vadd.f32 %v3399_v20, %v2378_v35 }
 0x350   : > { %v2380_v1 = vadd.f32 %v2379_v7, %v2347_v43 }
 0x352   : > { %v2381_v51 = vrot.slane %v2380_v1, 4 }
 0x354   : > { %v2382_v25 = vadd.f32 %v2381_v51, %v2380_v1 }
 0x356   : > { %v2383_v30 = vrot.slane %v2382_v25, 2 }
 0x358   : > { %v2384_v38 = vadd.f32 %v2383_v30, %v2382_v25 }
 0x35a   : > { %v2385_v47 = vrot.slane %v2384_v38, 1 }
 0x35c   : > { %v2386_v10 = vadd.f32 %v2385_v47, %v2384_v38 }
 0x35e   : > { %v2387_v49 = vadd.f32 %v2386_v10, %v2349_v27 }
 0x360   : > { %2388 = vst [vmem:[#allocation4] sm:$0x1] %v2387_v49 }
 0x361 PF: > { %p2773_p6 = scmp.ne.s32.totalorder %s3512_s15, 1 }
 0x362   : > { %v2395_v45 = vld [vmem:[#allocation2] sm:$0xff] (!%p2773_p6)  ;;  %v2533_v53 = vlaneseq (!%p2773_p6)  ;;  %v2396_v11 = vld [vmem:[#allocation2 + $0x8] sm:$0xff] (!%p2773_p6)  ;;  %v2397_v55 = vld [vmem:[#allocation2 + $0x10] sm:$0xff] (!%p2773_p6) }
 0x363   : > { %2393 = sbr.rel (%p2773_p6) target bundleno = 918 (0x396), region = 48  ;;  %v4884_v24 = vld [vmem:[#allocation3] ss:$0 sm:$0xff] (!%p2773_p6)  ;;  %v2398_v6 = vld [vmem:[#allocation2 + $0x18] sm:$0xff] (!%p2773_p6)  ;;  %v2400_v5 = vld [vmem:[#allocation2 + $0x28] sm:$0xff] (!%p2773_p6) }
 0x364   : > { %v2434_v41 = vsub.f32 (!%p2773_p6), %v2395_v45, %v4884_v24  ;;  %v2534_v14 = vshrl.u32 (!%p2773_p6), %v2533_v53, 7  ;;  %v2435_v17 = vsub.f32 (!%p2773_p6), %v2396_v11, %v4884_v24  ;;  %v2436_v54 = vsub.f32 (!%p2773_p6), %v2397_v55, %v4884_v24  ;;  %v2399_v59 = vld [vmem:[#allocation2 + $0x20] sm:$0xff] (!%p2773_p6)  ;;  %v2401_v29 = vld [vmem:[#allocation2 + $0x30] sm:$0xff] (!%p2773_p6)  ;;  %v2402_v57 = vld [vmem:[#allocation2 + $0x38] sm:$0xff] (!%p2773_p6) }
 0x365   : > { %v2437_v32 = vsub.f32 (!%p2773_p6), %v2398_v6, %v4884_v24  ;;  %v2438_v39 = vsub.f32 (!%p2773_p6), %v2399_v59, %v4884_v24  ;;  %v2439_v13 = vsub.f32 (!%p2773_p6), %v2400_v5, %v4884_v24  ;;  %v2440_v60 = vsub.f32 (!%p2773_p6), %v2401_v29, %v4884_v24  ;;  %v2403_v36 = vld [vmem:[#allocation2 + $0x40] sm:$0xff] (!%p2773_p6)  ;;  %v2404_v19 = vld [vmem:[#allocation2 + $0x48] sm:$0xff] (!%p2773_p6)  ;;  %v2405_v34 = vld [vmem:[#allocation2 + $0x50] sm:$0xff] (!%p2773_p6) }
 0x366   : > { %v2466_v15 = vmul.f32 (!%p2773_p6), 1.442695, %v2434_v41  ;;  %v2468_v31 = vmul.f32 (!%p2773_p6), 1.442695, %v2435_v17  ;;  %v2470_v46 = vmul.f32 (!%p2773_p6), 1.442695, %v2436_v54  ;;  %v2441_v50 = vsub.f32 (!%p2773_p6), %v2402_v57, %v4884_v24 }
 0x367   : > { %v2530_v3 = vld [vmem:[#allocation4] sm:$0x1] (!%p2773_p6)  ;;  %v2472_v2 = vmul.f32 (!%p2773_p6), 1.442695, %v2437_v32  ;;  %v2474_v42 = vmul.f32 (!%p2773_p6), 1.442695, %v2438_v39  ;;  %v2442_v48 = vsub.f32 (!%p2773_p6), %v2403_v36, %v4884_v24  ;;  %v2443_v28 = vsub.f32 (!%p2773_p6), %v2404_v19, %v4884_v24 }
 0x368   : > { %3402 = vrcp.f32 (!%p2773_p6), %v2530_v3  ;;  %v2476_v33 = vmul.f32 (!%p2773_p6), 1.442695, %v2439_v13  ;;  %v2406_v62 = vld [vmem:[#allocation2 + $0x58] sm:$0xff] (!%p2773_p6)  ;;  %v2407_v4 = vld [vmem:[#allocation2 + $0x60] sm:$0xff] (!%p2773_p6)  ;;  %v2478_v23 = vmul.f32 (!%p2773_p6), 1.442695, %v2440_v60  ;;  %v2444_v8 = vsub.f32 (!%p2773_p6), %v2405_v34, %v4884_v24 }
 0x369   : > { %3404 = vpow2.f32 (!%p2773_p6), %v2466_v15  ;;  %v2408_v16 = vld [vmem:[#allocation2 + $0x68] sm:$0xff] (!%p2773_p6)  ;;  %v2535_v63 = vsub.s32 (!%p2773_p6), 0, %v2534_v14  ;;  %v2480_v26 = vmul.f32 (!%p2773_p6), 1.442695, %v2441_v50  ;;  %v2445_v21 = vsub.f32 (!%p2773_p6), %v2406_v62, %v4884_v24  ;;  %v2409_v58 = vld [vmem:[#allocation2 + $0x70] sm:$0xff] (!%p2773_p6)  ;;  %v2410_v9 = vld [vmem:[#allocation2 + $0x78] sm:$0xff] (!%p2773_p6) }
 0x36a   : > { %3406 = vpow2.f32 %v2468_v31  ;;  %v2482_v18 = vmul.f32 1.442695, %v2442_v48  ;;  %v2446_v40 = vsub.f32 %v2407_v4, %v4884_v24  ;;  %v2484_v0 = vmul.f32 1.442695, %v2443_v28  ;;  %v2411_v22 = vld [vmem:[#allocation2 + $0x80] sm:$0xff]  ;;  %v2412_v35 = vld [vmem:[#allocation2 + $0x88] sm:$0xff] }
 0x36b   : > { %3408 = vpow2.f32 %v2470_v46  ;;  %v2447_v61 = vsub.f32 %v2408_v16, %v4884_v24  ;;  %v2486_v56 = vmul.f32 1.442695, %v2444_v8  ;;  %v2448_v52 = vsub.f32 %v2409_v58, %v4884_v24  ;;  %v2413_v1 = vld [vmem:[#allocation2 + $0x90] sm:$0xff]  ;;  %v2414_v30 = vld [vmem:[#allocation2 + $0x98] sm:$0xff]  ;;  %v2415_v44 = vld [vmem:[#allocation2 + $0xa0] sm:$0xff] }
 0x36c   : > { %3410 = vpow2.f32 %v2472_v2  ;;  %v2488_v7 = vmul.f32 1.442695, %v2445_v21  ;;  %v2449_v43 = vsub.f32 %v2410_v9, %v4884_v24  ;;  %v2490_v51 = vmul.f32 1.442695, %v2446_v40  ;;  %v2416_v49 = vld [vmem:[#allocation2 + $0xa8] sm:$0xff]  ;;  %v2417_v11 = vld [vmem:[#allocation2 + $0xb0] sm:$0xff] }
 0x36d   : > { %3412 = vpow2.f32 %v2474_v42  ;;  %v2450_v25 = vsub.f32 %v2411_v22, %v4884_v24  ;;  %v2492_v38 = vmul.f32 1.442695, %v2447_v61  ;;  %v2451_v37 = vsub.f32 %v2412_v35, %v4884_v24  ;;  %v2418_v54 = vld [vmem:[#allocation2 + $0xb8] sm:$0xff]  ;;  %v2419_v15 = vld [vmem:[#allocation2 + $0xc0] sm:$0xff]  ;;  %v2420_v36 = vld [vmem:[#allocation2 + $0xc8] sm:$0xff] }
 0x36e   : > { %3414 = vpow2.f32 %v2476_v33  ;;  %v2494_v27 = vmul.f32 1.442695, %v2448_v52  ;;  %v2452_v10 = vsub.f32 %v2413_v1, %v4884_v24  ;;  %v2496_v53 = vmul.f32 1.442695, %v2449_v43  ;;  %v2421_v34 = vld [vmem:[#allocation2 + $0xd0] sm:$0xff]  ;;  %v2422_v62 = vld [vmem:[#allocation2 + $0xd8] sm:$0xff] }
 0x36f   : > { %3416 = vpow2.f32 %v2478_v23  ;;  %v2453_v41 = vsub.f32 %v2414_v30, %v4884_v24  ;;  %v2498_v14 = vmul.f32 1.442695, %v2450_v25  ;;  %v2454_v17 = vsub.f32 %v2415_v44, %v4884_v24  ;;  %v2423_v16 = vld [vmem:[#allocation2 + $0xe0] sm:$0xff]  ;;  %v2425_v22 = vld [vmem:[#allocation2 + $0xf0] sm:$0xff] }
 0x370   : > { %3418 = vpow2.f32 %v2480_v26  ;;  %v2500_v5 = vmul.f32 1.442695, %v2451_v37  ;;  %v2455_v29 = vsub.f32 %v2416_v49, %v4884_v24  ;;  %v2502_v60 = vmul.f32 1.442695, %v2452_v10 }
 0x371   : > { %3420 = vpow2.f32 %v2482_v18  ;;  %v2456_v57 = vsub.f32 %v2417_v11, %v4884_v24  ;;  %v2504_v50 = vmul.f32 1.442695, %v2453_v41  ;;  %v2457_v19 = vsub.f32 %v2418_v54, %v4884_v24  ;;  %v2424_v18 = vld [vmem:[#allocation2 + $0xe8] sm:$0xff] }
 0x372   : > { %v3403_v12 = vpop.eup %3402  ;;  %3422 = vpow2.f32 %v2484_v0  ;;  %v2506_v33 = vmul.f32 1.442695, %v2454_v17  ;;  %v2458_v48 = vsub.f32 %v2419_v15, %v4884_v24  ;;  %v2508_v28 = vmul.f32 1.442695, %v2455_v29 }
 0x373   : > { %v4901_v20 = vrot.slane %v3403_v12, %v2535_v63  ;;  %v3405_v47 = vpop.eup %3404  ;;  %3424 = vpow2.f32 %v2486_v56  ;;  %v2459_v8 = vsub.f32 %v2420_v36, %v4884_v24  ;;  %v2510_v21 = vmul.f32 1.442695, %v2456_v57 }
 0x374   : > { %v3407_v45 = vpop.eup %3406  ;;  %3426 = vpow2.f32 %v2488_v7  ;;  %v2460_v58 = vsub.f32 %v2421_v34, %v4884_v24  ;;  %v2512_v0 = vmul.f32 1.442695, %v2457_v19  ;;  %v2461_v61 = vsub.f32 %v2422_v62, %v4884_v24  ;;  %v2426_v7 = vld [vmem:[#allocation2 + $0xf8] sm:$0xff] }
 0x375   : > { %v2538_v3 = vmul.f32 %v3405_v47, %v4901_v20  ;;  %v3409_v55 = vpop.eup %3408  ;;  %v2539_v6 = vmul.f32 %v3407_v45, %v4901_v20  ;;  %3428 = vpow2.f32 %v2490_v51  ;;  %v2514_v52 = vmul.f32 1.442695, %v2458_v48 }
 0x376   : > { %v3411_v32 = vpop.eup %3410  ;;  %v2540_v59 = vmul.f32 %v3409_v55, %v4901_v20  ;;  %3430 = vpow2.f32 %v2492_v38  ;;  %v2462_v35 = vsub.f32 %v2423_v16, %v4884_v24  ;;  %v2516_v51 = vmul.f32 1.442695, %v2459_v8 }
 0x377   : > { %2570 = vst [vmem:[#allocation5] sm:$0xff] %v2538_v3  ;;  %v3413_v39 = vpop.eup %3412  ;;  %2571 = vst [vmem:[#allocation5 + $0x8] sm:$0xff] %v2539_v6  ;;  %v2541_v13 = vmul.f32 %v3411_v32, %v4901_v20  ;;  %3432 = vpow2.f32 %v2494_v27  ;;  %v2463_v25 = vsub.f32 %v2424_v18, %v4884_v24  ;;  %v2518_v37 = vmul.f32 1.442695, %v2460_v58 }
 0x378   : > { %v3415_v31 = vpop.eup %3414  ;;  %2572 = vst [vmem:[#allocation5 + $0x10] sm:$0xff] %v2540_v59  ;;  %v2542_v46 = vmul.f32 %v3413_v39, %v4901_v20  ;;  %3434 = vpow2.f32 %v2496_v53  ;;  %v2464_v44 = vsub.f32 %v2425_v22, %v4884_v24  ;;  %v2520_v10 = vmul.f32 1.442695, %v2461_v61 }
 0x379   : > { %v3417_v2 = vpop.eup %3416  ;;  %2573 = vst [vmem:[#allocation5 + $0x18] sm:$0xff] %v2541_v13  ;;  %v2543_v42 = vmul.f32 %v3415_v31, %v4901_v20  ;;  %3436 = vpow2.f32 %v2498_v14  ;;  %v2465_v49 = vsub.f32 %v2426_v7, %v4884_v24  ;;  %v2522_v53 = vmul.f32 1.442695, %v2462_v35 }
 0x37a   : > { %v3419_v4 = vpop.eup %3418  ;;  %2574 = vst [vmem:[#allocation5 + $0x20] sm:$0xff] %v2542_v46  ;;  %v2544_v23 = vmul.f32 %v3417_v2, %v4901_v20  ;;  %3438 = vpow2.f32 %v2500_v5  ;;  %v2524_v55 = vmul.f32 1.442695, %v2463_v25  ;;  %v2526_v17 = vmul.f32 1.442695, %v2464_v44 }
 0x37b   : > { %v3421_v63 = vpop.eup %3420  ;;  %2575 = vst [vmem:[#allocation5 + $0x28] sm:$0xff] %v2543_v42  ;;  %v2545_v26 = vmul.f32 %v3419_v4, %v4901_v20  ;;  %3440 = vpow2.f32 %v2502_v60  ;;  %v2528_v32 = vmul.f32 1.442695, %v2465_v49 }
 0x37c   : > { %v3423_v40 = vpop.eup %3422  ;;  %2576 = vst [vmem:[#allocation5 + $0x30] sm:$0xff] %v2544_v23  ;;  %v2546_v9 = vmul.f32 %v3421_v63, %v4901_v20  ;;  %3442 = vpow2.f32 %v2504_v50 }
 0x37d   : > { %v3425_v12 = vpop.eup %3424  ;;  %2577 = vst [vmem:[#allocation5 + $0x38] sm:$0xff] %v2545_v26  ;;  %v2547_v56 = vmul.f32 %v3423_v40, %v4901_v20  ;;  %3444 = vpow2.f32 %v2506_v33 }
 0x37e   : > { %v3427_v43 = vpop.eup %3426  ;;  %2578 = vst [vmem:[#allocation5 + $0x40] sm:$0xff] %v2546_v9  ;;  %v2548_v1 = vmul.f32 %v3425_v12, %v4901_v20  ;;  %3446 = vpow2.f32 %v2508_v28 }
 0x37f   : > { %v3429_v30 = vpop.eup %3428  ;;  %2579 = vst [vmem:[#allocation5 + $0x48] sm:$0xff] %v2547_v56  ;;  %v2549_v38 = vmul.f32 %v3427_v43, %v4901_v20  ;;  %3448 = vpow2.f32 %v2510_v21 }
 0x380   : > { %v3431_v47 = vpop.eup %3430  ;;  %2580 = vst [vmem:[#allocation5 + $0x50] sm:$0xff] %v2548_v1  ;;  %v2550_v27 = vmul.f32 %v3429_v30, %v4901_v20  ;;  %3450 = vpow2.f32 %v2512_v0 }
 0x381   : > { %v3433_v45 = vpop.eup %3432  ;;  %2581 = vst [vmem:[#allocation5 + $0x58] sm:$0xff] %v2549_v38  ;;  %v2551_v3 = vmul.f32 %v3431_v47, %v4901_v20  ;;  %3452 = vpow2.f32 %v2514_v52 }
 0x382   : > { %v3435_v41 = vpop.eup %3434  ;;  %2582 = vst [vmem:[#allocation5 + $0x60] sm:$0xff] %v2550_v27  ;;  %v2552_v11 = vmul.f32 %v3433_v45, %v4901_v20  ;;  %3454 = vpow2.f32 %v2516_v51 }
 0x383   : > { %v3437_v6 = vpop.eup %3436  ;;  %2583 = vst [vmem:[#allocation5 + $0x68] sm:$0xff] %v2551_v3  ;;  %v2553_v14 = vmul.f32 %v3435_v41, %v4901_v20  ;;  %3456 = vpow2.f32 %v2518_v37 }
 0x384   : > { %v3439_v54 = vpop.eup %3438  ;;  %2584 = vst [vmem:[#allocation5 + $0x70] sm:$0xff] %v2552_v11  ;;  %v2554_v24 = vmul.f32 %v3437_v6, %v4901_v20  ;;  %3458 = vpow2.f32 %v2520_v10 }
 0x385   : > { %v3441_v59 = vpop.eup %3440  ;;  %2585 = vst [vmem:[#allocation5 + $0x78] sm:$0xff] %v2553_v14  ;;  %v2555_v5 = vmul.f32 %v3439_v54, %v4901_v20  ;;  %3460 = vpow2.f32 %v2522_v53 }
 0x386   : > { %v3443_v29 = vpop.eup %3442  ;;  %2586 = vst [vmem:[#allocation5 + $0x80] sm:$0xff] %v2554_v24  ;;  %v2556_v15 = vmul.f32 %v3441_v59, %v4901_v20  ;;  %3462 = vpow2.f32 %v2524_v55 }
 0x387   : > { %v3445_v39 = vpop.eup %3444  ;;  %2587 = vst [vmem:[#allocation5 + $0x88] sm:$0xff] %v2555_v5  ;;  %v2557_v13 = vmul.f32 %v3443_v29, %v4901_v20  ;;  %3464 = vpow2.f32 %v2526_v17 }
 0x388   : > { %v3447_v60 = vpop.eup %3446  ;;  %2588 = vst [vmem:[#allocation5 + $0x90] sm:$0xff] %v2556_v15  ;;  %v2558_v57 = vmul.f32 %v3445_v39, %v4901_v20  ;;  %3466 = vpow2.f32 %v2528_v32 }
 0x389   : > { %v3449_v36 = vpop.eup %3448  ;;  %2589 = vst [vmem:[#allocation5 + $0x98] sm:$0xff] %v2557_v13  ;;  %v2559_v31 = vmul.f32 %v3447_v60, %v4901_v20 }
 0x38a   : > { %v3451_v46 = vpop.eup %3450  ;;  %2590 = vst [vmem:[#allocation5 + $0xa0] sm:$0xff] %v2558_v57  ;;  %v2560_v50 = vmul.f32 %v3449_v36, %v4901_v20 }
 0x38b   : > { %v3453_v19 = vpop.eup %3452  ;;  %2591 = vst [vmem:[#allocation5 + $0xa8] sm:$0xff] %v2559_v31  ;;  %v2561_v34 = vmul.f32 %v3451_v46, %v4901_v20 }
 0x38c   : > { %v3455_v2 = vpop.eup %3454  ;;  %2592 = vst [vmem:[#allocation5 + $0xb0] sm:$0xff] %v2560_v50  ;;  %v2562_v42 = vmul.f32 %v3453_v19, %v4901_v20 }
 0x38d   : > { %v3457_v33 = vpop.eup %3456  ;;  %2593 = vst [vmem:[#allocation5 + $0xb8] sm:$0xff] %v2561_v34  ;;  %v2563_v48 = vmul.f32 %v3455_v2, %v4901_v20 }
 0x38e   : > { %v3459_v62 = vpop.eup %3458  ;;  %2594 = vst [vmem:[#allocation5 + $0xc0] sm:$0xff] %v2562_v42  ;;  %v2564_v4 = vmul.f32 %v3457_v33, %v4901_v20 }
 0x38f   : > { %v3461_v23 = vpop.eup %3460  ;;  %2595 = vst [vmem:[#allocation5 + $0xc8] sm:$0xff] %v2563_v48  ;;  %v2565_v28 = vmul.f32 %v3459_v62, %v4901_v20 }
 0x390   : > { %v3463_v8 = vpop.eup %3462  ;;  %2596 = vst [vmem:[#allocation5 + $0xd0] sm:$0xff] %v2564_v4  ;;  %v2566_v16 = vmul.f32 %v3461_v23, %v4901_v20 }
 0x391   : > { %v3465_v63 = vpop.eup %3464  ;;  %2597 = vst [vmem:[#allocation5 + $0xd8] sm:$0xff] %v2565_v28  ;;  %v2567_v26 = vmul.f32 %v3463_v8, %v4901_v20 }
 0x392   : > { %v3467_v21 = vpop.eup %3466  ;;  %2598 = vst [vmem:[#allocation5 + $0xe0] sm:$0xff] %v2566_v16  ;;  %v2568_v58 = vmul.f32 %v3465_v63, %v4901_v20 }
 0x393   : > { %2599 = vst [vmem:[#allocation5 + $0xe8] sm:$0xff] %v2567_v26  ;;  %v2569_v18 = vmul.f32 %v3467_v21, %v4901_v20 }
 0x394   : > { %2600 = vst [vmem:[#allocation5 + $0xf0] sm:$0xff] %v2568_v58 }
 0x395   : > { %2601 = vst [vmem:[#allocation5 + $0xf8] sm:$0xff] %v2569_v18 }
 0x396 PF: > { %p4954_p7 = scmp.eq.s32.totalorder %s2691_s18, 1  ;;  %s3524_s25 = smov [#allocation5]  }
 0x397   : > { %s2617_s26 = sshll.u32 %s3524_s25, 4  ;;  %s2618_s26 = int_to_ptr.vmem [resolvable:$true] %s2617_s26 }
 0x398   : > { %s3468_s27 = scalar_lea.vmem %s2618_s26, 4096  ;;  %s3474_s28 = scalar_lea.vmem %s2618_s26, 8192 }
 0x399   : > { %p3469_p8 = scmp.ne.s32.totalorder %s2618_s26, %s3468_s27  ;;  %p3475_p11 = scmp.lt.s32.totalorder %s2618_s26, %s2618_s26 }
 0x39a   : > { %p3476_p12 = scmp.lt.s32.totalorder %s3474_s28, %s3468_s27 }
 0x39b   : > { %p3470_p9 = pnand %p3469_p8, %p4954_p7 }
 0x39c   : > { %p3477_p13 = por %p3476_p12, %p3475_p11 }
 0x39d   : > { %p3471_p10 = pneg %p3470_p9 }
 0x39f   : > { %p3478_p0 = pnand %p3477_p13, %p3471_p10 }
 0x3a1   : > { %3481 = shalt.err (!%p3478_p0)
}
 0x3a2   : > { %s3482_s30 = scalar_lea.hbm %s4992_s4, 4096 }
 0x3a3   : > { %p3483_p1 = scmp.ne.s32.totalorder %s4992_s4, %s3482_s30  ;;  %p3488_p4 = scmp.lt.u32.totalorder %s3482_s30, %s4992_s4 }
 0x3a5   : > { %p3484_p2 = pnand %p3483_p1, %p4954_p7 }
 0x3a7   : > { %p3485_p3 = pneg %p3484_p2 }
 0x3a9   : > { %p3490_p5 = pnand %p3488_p4, %p3485_p3 }
 0x3ab   : > { %3493 = shalt.err (!%p3490_p5)
}
 0x3ac   : > { %s3525_s9 = smov 128   ;;  %s3526_s10 = smov 8  }
 0x3ad   : > { %3240 = dma.vmem_to_hbm [thread:$0]  (%p4954_p7), %s2618_s26, 4096, %s4992_s4, [#allocation6], %s3525_s9, %s3525_s9, %s3526_s10  }
 0x3ae PF: > { %p3248_p6 = scmp.ge.s32.totalorder %s3520_s17, 2  ;;  %p3249_p8 = scmp.eq.s32.totalorder %s2692_s19, 1 }
 0x3b0   : > { %p3244_p9 = pnand %p3249_p8, %p3248_p6 }
 0x3b2   : > { %3507 = dma.done.wait (!%p3244_p9), [#allocation6], 4096  }
 0x3b3   : > { %3509 = vsyncadd (!%p3244_p9), [#allocation6], 4294963200  ;;  %s17_s17 = sadd.s32 1, %s3520_s17   ;;  %s4996_s15 = smov %s3516_s16 }
 0x3b4   : > { %p14_p10 = scmp.ge.s32.totalorder %s17_s17, 4   ;;  %s4997_s16 = smov %s4999_s20 }
 0x3b6   :  { %16 = sbr.rel (!%p14_p10) target bundleno = 3 (0x3), region = 85 }
 0x3bd   :  { %2638 = vsyncpa [#allocation6], 1 }
 0x3be   :  { %2640 = vsyncpa [#allocation6 + $0x1], 1 }

</bundles_post_ra>
